<compile_context>
chip_gen: v7x
topology: tpu7x:2x2x1
jax: 0.10.0
libtpu: 0.0.40
codegen_flags: <defaults>
</compile_context>

<pallas_src>
import numpy as np
import jax
import jax.numpy as jnp
from jax.experimental import pallas as pl
from jax.experimental.pallas import tpu as pltpu

LN_EPS = 1e-5  # torch.nn.LayerNorm / F.layer_norm default


# --------------------------------------------------------------------------- helpers
def _const_spec(arr):
    """Full-array block with a constant index map (parameter stays resident in VMEM)."""
    zeros = (0,) * arr.ndim
    return pl.BlockSpec(arr.shape, lambda i, _z=zeros: _z)


def _pick_block_b(batch):
    """Samples per grid step: keep the parallel axis >= 2 (v7x has two TensorCores) while
    amortizing the ~600-cycle per-grid-step overhead for larger batches."""
    for bb in (8, 4, 2, 1):
        if batch % bb == 0 and batch // bb >= 2:
            return bb
    return batch


def build_gather_mats(K, in_hw, out_hw):
    """One-hot gather matrices G[t] of shape (IH*IW, OH*OW), t = kh*K + kw, folding
    nearest upsample (src = floor(dst*in/out)) + conv tap shift + zero-pad mask into
    a single bf16 matmul per tap:  tap_t = x_small @ G[t]."""
    IH, IW = in_hw
    OH, OW = out_hw
    pad = K // 2
    G = np.zeros((K * K, IH * IW, OH * OW), np.float32)
    for kh in range(K):
        for kw in range(K):
            t = kh * K + kw
            dh, dw = kh - pad, kw - pad
            for a in range(OH):
                ah = a + dh
                if not 0 <= ah < OH:
                    continue
                sh = (ah * IH) // OH
                for b in range(OW):
                    aw = b + dw
                    if not 0 <= aw < OW:
                        continue
                    sw = (aw * IW) // OW
                    G[t, sh * IW + sw, a * OW + b] = 1.0
    return jnp.asarray(G, jnp.bfloat16)


def build_unflatten_mats(C, S):
    """Constants turning a flat (1, C*S) row into a (C, S) channels-on-sublanes /
    spatial-on-lanes tile via mask + one-hot matmul (no in-kernel reshape/relayout):
        x_sp = (row * M) @ R   with   M[c, f] = [f // S == c],  R[f, q] = [f % S == q]."""
    F = C * S
    f = np.arange(F)
    M = (f[None, :] // S == np.arange(C)[:, None]).astype(np.float32)   # (C, F)
    R = (f[:, None] % S == np.arange(S)[None, :]).astype(np.float32)    # (F, S)
    return jnp.asarray(M, jnp.bfloat16), jnp.asarray(R, jnp.bfloat16)


# ----------------------------------------------------------------------------- kernel
def make_decoder_kernel(block_b, lin_has_ln, conv_cfg):
    """Fully fused decoder forward for one batch block.

    ref order: x, [per linear layer: W, b (, gamma, beta)], M, R,
               [per conv layer: G, WT, b (, gamma, beta)], out, h_scratch
    """
    def kernel(*refs):
        x_ref, o_ref, hs_ref = refs[0], refs[-2], refs[-1]
        params = refs[1:-2]

        # ------------- fused LinearBlock over the whole (block_b, F) block -------------
        h = x_ref[:, 0, :]
        idx = 0
        for has_ln in lin_has_ln:
            w_ref, b_ref = params[idx], params[idx + 1]
            idx += 2
            y = jnp.dot(h.astype(jnp.bfloat16), w_ref[...],
                        preferred_element_type=jnp.float32) + b_ref[...]
            if has_ln:
                g_ref, be_ref = params[idx], params[idx + 1]
                idx += 2
                mu = jnp.mean(y, axis=-1, keepdims=True)
                var = jnp.mean((y - mu) * (y - mu), axis=-1, keepdims=True)
                y = (y - mu) * jax.lax.rsqrt(var + LN_EPS) * g_ref[...] + be_ref[...]
                y = jnp.maximum(y, 0.0)
            h = y
        hs_ref[...] = h                                   # park in VMEM scratch for per-sample reads
        m_ref, r_ref = params[idx], params[idx + 1]
        conv_start = idx + 2

        # ------------- decoder conv stack, per sample (static unroll over the block) -------------
        for s in range(block_b):
            row = hs_ref[pl.ds(s, 1), :]                  # (1, C0*H0*W0)
            # flat NCHW row -> (C0, H0*W0): channels on sublanes, spatial lane-dense.
            x_sp = jnp.dot((row * m_ref[...]).astype(jnp.bfloat16), r_ref[...],
                           preferred_element_type=jnp.float32)
            idx = conv_start
            for (ksz, ln_act, n_elems) in conv_cfg:
                g_ref, wt_ref, b_ref = params[idx], params[idx + 1], params[idx + 2]
                idx += 3
                x_b = x_sp.astype(jnp.bfloat16)
                # upsample + tap shift + pad mask as one-hot matmuls; stack the K*K taps along the
                # contraction axis so the conv itself is a single deep MXU matmul.
                taps = [jnp.dot(x_b, g_ref[t], preferred_element_type=jnp.float32)
                        for t in range(ksz * ksz)]
                x_cat = jnp.concatenate(taps, axis=0).astype(jnp.bfloat16)      # (K*K*cin, S)
                y = jnp.dot(wt_ref[...], x_cat,
                            preferred_element_type=jnp.float32) + b_ref[...]    # (cout, S)
                if ln_act:
                    ga_ref, be_ref = params[idx], params[idx + 1]
                    idx += 2
                    mu = jnp.sum(jnp.sum(y, axis=1, keepdims=True),
                                 axis=0, keepdims=True) / n_elems
                    d = y - mu
                    var = jnp.sum(jnp.sum(d * d, axis=1, keepdims=True),
                                  axis=0, keepdims=True) / n_elems
                    y = d * jax.lax.rsqrt(var + LN_EPS) * ga_ref[...] + be_ref[...]
                    y = jnp.maximum(y, 0.0)
                x_sp = y
            o_ref[s] = x_sp                               # already flat NCHW: (C, H*W)
    return kernel


# ------------------------------------------------------------------------------ model
class DecoderBlockPallas:
    def __init__(self, key, channel_list_rev, kernel_list_rev, stride_list_rev,
                 hidden_list_rev, in_features, out_shape, activation='relu'):
        assert activation == 'relu'   # TODO(synk): 'elu' branch not implemented
        assert len(channel_list_rev) == len(kernel_list_rev) == len(stride_list_rev)

        # --- replicate DecoderBlock.__init__ layer construction (reverse order) ---
        conv_layers = []
        out_ch, out_ht, out_wd = out_shape
        layer_act = None
        for num_channels, ksz, stride in zip(channel_list_rev, kernel_list_rev, stride_list_rev):
            assert ksz % 2 == 1
            in_ht = (out_ht - 1) // stride + 1
            in_wd = (out_wd - 1) // stride + 1
            conv_layers.insert(0, dict(
                in_hw=(in_ht, in_wd), out_hw=(out_ht, out_wd),
                cin=num_channels, cout=out_ch, k=ksz,
                ln_act=(layer_act is not None)))
            out_ch, out_ht, out_wd = num_channels, in_ht, in_wd
            layer_act = activation

        hidden_list = list(reversed(hidden_list_rev))
        out_features = out_ch * out_ht * out_wd
        final_plain = None
        if layer_act is not None:
            hidden_list.append(out_features)
        else:
            final_plain = out_features
        self.in_shape = (out_ch, out_ht, out_wd)

        # --- deterministic init (kaiming fan_in; relu gain=2, linear gain=1; zero bias;
        #     LN gamma=1 / beta=0).  MXU weights pre-cast to bf16 once. ---
        lin_layers = []
        fan_in = in_features
        for nf in hidden_list:
            key, k1 = jax.random.split(key)
            W = jax.random.normal(k1, (fan_in, nf), jnp.float32) * jnp.sqrt(2.0 / fan_in)
            lin_layers.append(dict(Wb16=W.astype(jnp.bfloat16),
                                   b=jnp.zeros((1, nf), jnp.float32),
                                   gamma=jnp.ones((1, nf), jnp.float32),
                                   beta=jnp.zeros((1, nf), jnp.float32),
                                   ln_act=True))
            fan_in = nf
        if final_plain is not None:
            key, k1 = jax.random.split(key)
            W = jax.random.normal(k1, (fan_in, final_plain), jnp.float32) * jnp.sqrt(1.0 / fan_in)
            lin_layers.append(dict(Wb16=W.astype(jnp.bfloat16),
                                   b=jnp.zeros((1, final_plain), jnp.float32),
                                   ln_act=False))
        self.lin_layers = lin_layers

        for layer in conv_layers:
            key, k1 = jax.random.split(key)
            K, cin, cout = layer['k'], layer['cin'], layer['cout']
            gain = 2.0 if layer['ln_act'] else 1.0
            Whwio = jax.random.normal(k1, (K, K, cin, cout), jnp.float32) * jnp.sqrt(gain / (K * K * cin))
            Wb16_hwio = Whwio.astype(jnp.bfloat16)
            layer['Whwio_b16'] = Wb16_hwio                               # for the JAX reference
            layer['WT'] = Wb16_hwio.reshape(K * K * cin, cout).T         # (cout, K*K*cin): col = t*cin+ci
            layer['b'] = jnp.zeros((cout, 1), jnp.float32)
            layer['G'] = build_gather_mats(K, layer['in_hw'], layer['out_hw'])
            if layer['ln_act']:
                layer['gamma'] = jnp.ones((cout, 1), jnp.float32)
                layer['beta'] = jnp.zeros((cout, 1), jnp.float32)
        self.conv_layers = conv_layers

        C0, H0, W0 = self.in_shape
        self.unflat_M, self.unflat_R = build_unflatten_mats(C0, H0 * W0)

        self._forward = jax.jit(self._forward_impl)

    # ---- fully fused forward: one pallas_call ----
    def _forward_impl(self, x):
        B, in_f = x.shape
        block_b = _pick_block_b(B)
        grid = (B // block_b,)
        C0, H0, W0 = self.in_shape
        if self.conv_layers:
            last = self.conv_layers[-1]
            C_out = last['cout']
            OH_out, OW_out = last['out_hw']
        else:
            C_out, OH_out, OW_out = C0, H0, W0
        S_out = OH_out * OW_out

        args = [x.reshape(B, 1, in_f)]
        in_specs = [pl.BlockSpec((block_b, 1, in_f), lambda i: (i, 0, 0))]

        lin_has_ln = []
        for layer in self.lin_layers:
            lin_has_ln.append(layer['ln_act'])
            names = ('Wb16', 'b', 'gamma', 'beta') if layer['ln_act'] else ('Wb16', 'b')
            for n in names:
                args.append(layer[n])
                in_specs.append(_const_spec(layer[n]))

        args += [self.unflat_M, self.unflat_R]
        in_specs += [_const_spec(self.unflat_M), _const_spec(self.unflat_R)]

        conv_cfg = []
        for layer in self.conv_layers:
            OH, OW = layer['out_hw']
            conv_cfg.append((layer['k'], layer['ln_act'], float(layer['cout'] * OH * OW)))
            names = ('G', 'WT', 'b', 'gamma', 'beta') if layer['ln_act'] else ('G', 'WT', 'b')
            for n in names:
                args.append(layer[n])
                in_specs.append(_const_spec(layer[n]))

        kernel = make_decoder_kernel(block_b, tuple(lin_has_ln), tuple(conv_cfg))
        y = pl.pallas_call(
            kernel,
            grid=grid,
            in_specs=in_specs,
            out_specs=pl.BlockSpec((block_b, C_out, S_out), lambda i: (i, 0, 0)),
            out_shape=jax.ShapeDtypeStruct((B, C_out, S_out), jnp.float32),
            scratch_shapes=[pltpu.VMEM((block_b, C0 * H0 * W0), jnp.float32)],
            compiler_params=pltpu.CompilerParams(dimension_semantics=("parallel",)),
        )(*args)
        return y.reshape(B, C_out, OH_out, OW_out)   # free reshape: kernel already wrote flat NCHW

    def __call__(self, x):
        return self._forward(x)


# -------------------------------------------------------------------- pure-JAX reference
def nearest_upsample_nhwc(x, out_hw):
    # F.interpolate(mode='nearest'): src = floor(dst * in / out)
    B, H, W, C = x.shape
    oh, ow = out_hw
    if (H, W) == (oh, ow):
        return x
    hi = (jnp.arange(oh) * H) // oh
    wi = (jnp.arange(ow) * W) // ow
    return x[:, hi][:, :, wi]


def reference_forward(model, x):
    # Mirrors the kernel numerics (bf16 MXU operands, f32 accumulation / LN statistics),
    # but uses lax.conv + explicit upsample so it independently validates the gather matrices.
    for layer in model.lin_layers:
        y = jnp.dot(x.astype(jnp.bfloat16), layer['Wb16'],
                    preferred_element_type=jnp.float32) + layer['b']
        if layer['ln_act']:
            mu = y.mean(-1, keepdims=True)
            var = ((y - mu) ** 2).mean(-1, keepdims=True)
            y = (y - mu) * jax.lax.rsqrt(var + LN_EPS) * layer['gamma'] + layer['beta']
            y = jnp.maximum(y, 0.0)
        x = y
    B = x.shape[0]
    C0, H0, W0 = model.in_shape
    x = x.reshape(B, C0, H0, W0).transpose(0, 2, 3, 1)   # NHWC for lax.conv
    for layer in model.conv_layers:
        cout = layer['cout']
        x = nearest_upsample_nhwc(x.astype(jnp.bfloat16), layer['out_hw'])
        y = jax.lax.conv_general_dilated(
            x, layer['Whwio_b16'], (1, 1), 'SAME',
            dimension_numbers=('NHWC', 'HWIO', 'NHWC'),
            preferred_element_type=jnp.float32)
        y = y + layer['b'].reshape(1, 1, 1, cout)
        if layer['ln_act']:
            mu = y.mean(axis=(1, 2, 3), keepdims=True)
            var = ((y - mu) ** 2).mean(axis=(1, 2, 3), keepdims=True)
            y = (y - mu) * jax.lax.rsqrt(var + LN_EPS)
            y = y * layer['gamma'].reshape(1, 1, 1, cout) + layer['beta'].reshape(1, 1, 1, cout)
            y = jnp.maximum(y, 0.0)
        x = y
    return x.transpose(0, 3, 1, 2)


# ------------------------------------------------------------------------------- main
if __name__ == "__main__":
    root = jax.random.PRNGKey(0)
    param_key, x_key = jax.random.split(root)

    B = 2
    in_features = 16
    channel_list_rev = [8, 16]
    kernel_list_rev = [3, 3]
    stride_list_rev = [2, 2]
    hidden_list_rev = [32]
    out_shape = (3, 16, 16)   # final output: (B, 3, 16, 16) NCHW

    model = DecoderBlockPallas(param_key, channel_list_rev, kernel_list_rev,
                               stride_list_rev, hidden_list_rev,
                               in_features, out_shape, activation='relu')

    x = jax.random.normal(x_key, (B, in_features), jnp.float32)

    y = jax.block_until_ready(model(x))
    assert y.shape == (B,) + out_shape, y.shape
    assert bool(jnp.all(jnp.isfinite(y)))

    # correctness check against an independent pure-JAX reference with matching bf16/f32 numerics
    y_ref = jax.block_until_ready(reference_forward(model, x))
    max_err = float(jnp.max(jnp.abs(y - y_ref)))
    assert jnp.allclose(y, y_ref, rtol=1e-2, atol=1e-2), max_err

    print("KERNEL_OK")
</pallas_src>

<mosaic_0001>
module attributes {stable_mosaic.version = 11 : i64} {
  func.func @kernel(%arg0: i32, %arg1: memref<1x1x16xf32, #tpu.memory_space<vmem>>, %arg2: memref<16x32xbf16, #tpu.memory_space<vmem>>, %arg3: memref<1x32xf32, #tpu.memory_space<vmem>>, %arg4: memref<1x32xf32, #tpu.memory_space<vmem>>, %arg5: memref<1x32xf32, #tpu.memory_space<vmem>>, %arg6: memref<32x256xbf16, #tpu.memory_space<vmem>>, %arg7: memref<1x256xf32, #tpu.memory_space<vmem>>, %arg8: memref<1x256xf32, #tpu.memory_space<vmem>>, %arg9: memref<1x256xf32, #tpu.memory_space<vmem>>, %arg10: memref<16x256xbf16, #tpu.memory_space<vmem>>, %arg11: memref<256x16xbf16, #tpu.memory_space<vmem>>, %arg12: memref<9x16x64xbf16, #tpu.memory_space<vmem>>, %arg13: memref<8x144xbf16, #tpu.memory_space<vmem>>, %arg14: memref<8x1xf32, #tpu.memory_space<vmem>>, %arg15: memref<8x1xf32, #tpu.memory_space<vmem>>, %arg16: memref<8x1xf32, #tpu.memory_space<vmem>>, %arg17: memref<9x64x256xbf16, #tpu.memory_space<vmem>>, %arg18: memref<3x72xbf16, #tpu.memory_space<vmem>>, %arg19: memref<3x1xf32, #tpu.memory_space<vmem>>, %arg20: memref<1x3x256xf32, #tpu.memory_space<vmem>>, %arg21: memref<1x256xf32, #tpu.memory_space<vmem>>) attributes {dimension_semantics = [#tpu.dimension_semantics<parallel>], iteration_bounds = array<i64: 2>, scalar_prefetch = 0 : i64, scratch_operands = 1 : i64, tpu.core_type = #tpu.core_type<tc>, window_params = [{transform_indices = @transform_0, window_bounds = array<i64: 1, 1, 16>}, {pipeline_mode = #tpu.pipeline_mode<synchronous>, transform_indices = @transform_1, window_bounds = array<i64: 16, 32>}, {pipeline_mode = #tpu.pipeline_mode<synchronous>, transform_indices = @transform_2, window_bounds = array<i64: 1, 32>}, {pipeline_mode = #tpu.pipeline_mode<synchronous>, transform_indices = @transform_3, window_bounds = array<i64: 1, 32>}, {pipeline_mode = #tpu.pipeline_mode<synchronous>, transform_indices = @transform_4, window_bounds = array<i64: 1, 32>}, {pipeline_mode = #tpu.pipeline_mode<synchronous>, transform_indices = @transform_5, window_bounds = array<i64: 32, 256>}, {pipeline_mode = #tpu.pipeline_mode<synchronous>, transform_indices = @transform_6, window_bounds = array<i64: 1, 256>}, {pipeline_mode = #tpu.pipeline_mode<synchronous>, transform_indices = @transform_7, window_bounds = array<i64: 1, 256>}, {pipeline_mode = #tpu.pipeline_mode<synchronous>, transform_indices = @transform_8, window_bounds = array<i64: 1, 256>}, {pipeline_mode = #tpu.pipeline_mode<synchronous>, transform_indices = @transform_9, window_bounds = array<i64: 16, 256>}, {pipeline_mode = #tpu.pipeline_mode<synchronous>, transform_indices = @transform_10, window_bounds = array<i64: 256, 16>}, {pipeline_mode = #tpu.pipeline_mode<synchronous>, transform_indices = @transform_11, window_bounds = array<i64: 9, 16, 64>}, {pipeline_mode = #tpu.pipeline_mode<synchronous>, transform_indices = @transform_12, window_bounds = array<i64: 8, 144>}, {pipeline_mode = #tpu.pipeline_mode<synchronous>, transform_indices = @transform_13, window_bounds = array<i64: 8, 1>}, {pipeline_mode = #tpu.pipeline_mode<synchronous>, transform_indices = @transform_14, window_bounds = array<i64: 8, 1>}, {pipeline_mode = #tpu.pipeline_mode<synchronous>, transform_indices = @transform_15, window_bounds = array<i64: 8, 1>}, {pipeline_mode = #tpu.pipeline_mode<synchronous>, transform_indices = @transform_16, window_bounds = array<i64: 9, 64, 256>}, {pipeline_mode = #tpu.pipeline_mode<synchronous>, transform_indices = @transform_17, window_bounds = array<i64: 3, 72>}, {pipeline_mode = #tpu.pipeline_mode<synchronous>, transform_indices = @transform_18, window_bounds = array<i64: 3, 1>}, {transform_indices = @transform_19, window_bounds = array<i64: 1, 3, 256>}]} {
    %c0 = arith.constant 0 : index
    %c0_0 = arith.constant 0 : index
    %c0_1 = arith.constant 0 : index
    %0 = vector.load %arg1[%c0, %c0_0, %c0_1] : memref<1x1x16xf32, #tpu.memory_space<vmem>>, vector<1x1x16xf32>
    %1 = vector.shape_cast %0 : vector<1x1x16xf32> to vector<1x16xf32>
    %2 = arith.truncf %1 : vector<1x16xf32> to vector<1x16xbf16>
    %c0_2 = arith.constant 0 : index
    %c0_3 = arith.constant 0 : index
    %3 = vector.load %arg2[%c0_2, %c0_3] : memref<16x32xbf16, #tpu.memory_space<vmem>>, vector<16x32xbf16>
    %cst = arith.constant dense<0.000000e+00> : vector<1x32xf32>
    %4 = tpu.matmul %2, %3, %cst {dimension_numbers = #tpu.dot_dimension_numbers<[1], [0], [0], [1], [0, 0, 1, 1], [], []>} : vector<1x16xbf16>, vector<16x32xbf16>, vector<1x32xf32> -> vector<1x32xf32>
    %c0_4 = arith.constant 0 : index
    %c0_5 = arith.constant 0 : index
    %5 = vector.load %arg3[%c0_4, %c0_5] : memref<1x32xf32, #tpu.memory_space<vmem>>, vector<1x32xf32>
    %6 = arith.addf %4, %5 : vector<1x32xf32>
    %cst_6 = arith.constant dense<0.000000e+00> : vector<1xf32>
    %7 = vector.multi_reduction <add>, %6, %cst_6 [1] : vector<1x32xf32> to vector<1xf32>
    %8 = vector.shape_cast %7 : vector<1xf32> to vector<1x1xf32>
    %cst_7 = arith.constant 3.200000e+01 : f32
    %9 = vector.broadcast %cst_7 : f32 to vector<1x1xf32>
    %10 = arith.divf %8, %9 : vector<1x1xf32>
    %11 = vector.broadcast %10 : vector<1x1xf32> to vector<1x32xf32>
    %12 = arith.subf %6, %11 : vector<1x32xf32>
    %13 = vector.broadcast %10 : vector<1x1xf32> to vector<1x32xf32>
    %14 = arith.subf %6, %13 : vector<1x32xf32>
    %15 = arith.mulf %12, %14 : vector<1x32xf32>
    %cst_8 = arith.constant dense<0.000000e+00> : vector<1xf32>
    %16 = vector.multi_reduction <add>, %15, %cst_8 [1] : vector<1x32xf32> to vector<1xf32>
    %17 = vector.shape_cast %16 : vector<1xf32> to vector<1x1xf32>
    %cst_9 = arith.constant 3.200000e+01 : f32
    %18 = vector.broadcast %cst_9 : f32 to vector<1x1xf32>
    %19 = arith.divf %17, %18 : vector<1x1xf32>
    %20 = vector.broadcast %10 : vector<1x1xf32> to vector<1x32xf32>
    %21 = arith.subf %6, %20 : vector<1x32xf32>
    %cst_10 = arith.constant 9.99999974E-6 : f32
    %22 = vector.broadcast %cst_10 : f32 to vector<1x1xf32>
    %23 = arith.addf %19, %22 : vector<1x1xf32>
    %24 = math.rsqrt %23 : vector<1x1xf32>
    %25 = vector.broadcast %24 : vector<1x1xf32> to vector<1x32xf32>
    %26 = arith.mulf %21, %25 : vector<1x32xf32>
    %c0_11 = arith.constant 0 : index
    %c0_12 = arith.constant 0 : index
    %27 = vector.load %arg4[%c0_11, %c0_12] : memref<1x32xf32, #tpu.memory_space<vmem>>, vector<1x32xf32>
    %28 = arith.mulf %26, %27 : vector<1x32xf32>
    %c0_13 = arith.constant 0 : index
    %c0_14 = arith.constant 0 : index
    %29 = vector.load %arg5[%c0_13, %c0_14] : memref<1x32xf32, #tpu.memory_space<vmem>>, vector<1x32xf32>
    %30 = arith.addf %28, %29 : vector<1x32xf32>
    %cst_15 = arith.constant 0.000000e+00 : f32
    %31 = vector.broadcast %cst_15 : f32 to vector<1x32xf32>
    %32 = arith.maximumf %30, %31 : vector<1x32xf32>
    %33 = arith.truncf %32 : vector<1x32xf32> to vector<1x32xbf16>
    %c0_16 = arith.constant 0 : index
    %c0_17 = arith.constant 0 : index
    %34 = vector.load %arg6[%c0_16, %c0_17] : memref<32x256xbf16, #tpu.memory_space<vmem>>, vector<32x256xbf16>
    %cst_18 = arith.constant dense<0.000000e+00> : vector<1x256xf32>
    %35 = tpu.matmul %33, %34, %cst_18 {dimension_numbers = #tpu.dot_dimension_numbers<[1], [0], [0], [1], [0, 0, 1, 1], [], []>} : vector<1x32xbf16>, vector<32x256xbf16>, vector<1x256xf32> -> vector<1x256xf32>
    %c0_19 = arith.constant 0 : index
    %c0_20 = arith.constant 0 : index
    %36 = vector.load %arg7[%c0_19, %c0_20] : memref<1x256xf32, #tpu.memory_space<vmem>>, vector<1x256xf32>
    %37 = arith.addf %35, %36 : vector<1x256xf32>
    %cst_21 = arith.constant dense<0.000000e+00> : vector<1xf32>
    %38 = vector.multi_reduction <add>, %37, %cst_21 [1] : vector<1x256xf32> to vector<1xf32>
    %39 = vector.shape_cast %38 : vector<1xf32> to vector<1x1xf32>
    %cst_22 = arith.constant 2.560000e+02 : f32
    %40 = vector.broadcast %cst_22 : f32 to vector<1x1xf32>
    %41 = arith.divf %39, %40 : vector<1x1xf32>
    %42 = vector.broadcast %41 : vector<1x1xf32> to vector<1x256xf32>
    %43 = arith.subf %37, %42 : vector<1x256xf32>
    %44 = vector.broadcast %41 : vector<1x1xf32> to vector<1x256xf32>
    %45 = arith.subf %37, %44 : vector<1x256xf32>
    %46 = arith.mulf %43, %45 : vector<1x256xf32>
    %cst_23 = arith.constant dense<0.000000e+00> : vector<1xf32>
    %47 = vector.multi_reduction <add>, %46, %cst_23 [1] : vector<1x256xf32> to vector<1xf32>
    %48 = vector.shape_cast %47 : vector<1xf32> to vector<1x1xf32>
    %cst_24 = arith.constant 2.560000e+02 : f32
    %49 = vector.broadcast %cst_24 : f32 to vector<1x1xf32>
    %50 = arith.divf %48, %49 : vector<1x1xf32>
    %51 = vector.broadcast %41 : vector<1x1xf32> to vector<1x256xf32>
    %52 = arith.subf %37, %51 : vector<1x256xf32>
    %cst_25 = arith.constant 9.99999974E-6 : f32
    %53 = vector.broadcast %cst_25 : f32 to vector<1x1xf32>
    %54 = arith.addf %50, %53 : vector<1x1xf32>
    %55 = math.rsqrt %54 : vector<1x1xf32>
    %56 = vector.broadcast %55 : vector<1x1xf32> to vector<1x256xf32>
    %57 = arith.mulf %52, %56 : vector<1x256xf32>
    %c0_26 = arith.constant 0 : index
    %c0_27 = arith.constant 0 : index
    %58 = vector.load %arg8[%c0_26, %c0_27] : memref<1x256xf32, #tpu.memory_space<vmem>>, vector<1x256xf32>
    %59 = arith.mulf %57, %58 : vector<1x256xf32>
    %c0_28 = arith.constant 0 : index
    %c0_29 = arith.constant 0 : index
    %60 = vector.load %arg9[%c0_28, %c0_29] : memref<1x256xf32, #tpu.memory_space<vmem>>, vector<1x256xf32>
    %61 = arith.addf %59, %60 : vector<1x256xf32>
    %cst_30 = arith.constant 0.000000e+00 : f32
    %62 = vector.broadcast %cst_30 : f32 to vector<1x256xf32>
    %63 = arith.maximumf %61, %62 : vector<1x256xf32>
    %c0_31 = arith.constant 0 : index
    %c0_32 = arith.constant 0 : index
    %64 = vector.load %arg21[%c0_31, %c0_32] : memref<1x256xf32, #tpu.memory_space<vmem>>, vector<1x256xf32>
    tpu.vector_store %arg21[%c0_31, %c0_32], %63 {strides = array<i32>} : memref<1x256xf32, #tpu.memory_space<vmem>>, vector<1x256xf32>,
    %c0_33 = arith.constant 0 : index
    %c0_34 = arith.constant 0 : index
    %65 = vector.load %arg21[%c0_33, %c0_34] : memref<1x256xf32, #tpu.memory_space<vmem>>, vector<1x256xf32>
    %c0_35 = arith.constant 0 : index
    %c0_36 = arith.constant 0 : index
    %66 = vector.load %arg10[%c0_35, %c0_36] : memref<16x256xbf16, #tpu.memory_space<vmem>>, vector<16x256xbf16>
    %67 = arith.extf %66 : vector<16x256xbf16> to vector<16x256xf32>
    %68 = vector.broadcast %65 : vector<1x256xf32> to vector<16x256xf32>
    %69 = arith.mulf %68, %67 : vector<16x256xf32>
    %70 = arith.truncf %69 : vector<16x256xf32> to vector<16x256xbf16>
    %c0_37 = arith.constant 0 : index
    %c0_38 = arith.constant 0 : index
    %71 = vector.load %arg11[%c0_37, %c0_38] : memref<256x16xbf16, #tpu.memory_space<vmem>>, vector<256x16xbf16>
    %cst_39 = arith.constant dense<0.000000e+00> : vector<16x16xf32>
    %72 = tpu.matmul %70, %71, %cst_39 {dimension_numbers = #tpu.dot_dimension_numbers<[1], [0], [0], [1], [0, 0, 1, 1], [], []>} : vector<16x256xbf16>, vector<256x16xbf16>, vector<16x16xf32> -> vector<16x16xf32>
    %73 = arith.truncf %72 : vector<16x16xf32> to vector<16x16xbf16>
    %c0_40 = arith.constant 0 : index
    %c0_41 = arith.constant 0 : index
    %c0_42 = arith.constant 0 : index
    %74 = vector.load %arg12[%c0_40, %c0_41, %c0_42] : memref<9x16x64xbf16, #tpu.memory_space<vmem>>, vector<1x16x64xbf16>
    %75 = vector.shape_cast %74 : vector<1x16x64xbf16> to vector<16x64xbf16>
    %cst_43 = arith.constant dense<0.000000e+00> : vector<16x64xf32>
    %76 = tpu.matmul %73, %75, %cst_43 {dimension_numbers = #tpu.dot_dimension_numbers<[1], [0], [0], [1], [0, 0, 1, 1], [], []>} : vector<16x16xbf16>, vector<16x64xbf16>, vector<16x64xf32> -> vector<16x64xf32>
    %c1 = arith.constant 1 : index
    %c0_44 = arith.constant 0 : index
    %c0_45 = arith.constant 0 : index
    %77 = vector.load %arg12[%c1, %c0_44, %c0_45] : memref<9x16x64xbf16, #tpu.memory_space<vmem>>, vector<1x16x64xbf16>
    %78 = vector.shape_cast %77 : vector<1x16x64xbf16> to vector<16x64xbf16>
    %cst_46 = arith.constant dense<0.000000e+00> : vector<16x64xf32>
    %79 = tpu.matmul %73, %78, %cst_46 {dimension_numbers = #tpu.dot_dimension_numbers<[1], [0], [0], [1], [0, 0, 1, 1], [], []>} : vector<16x16xbf16>, vector<16x64xbf16>, vector<16x64xf32> -> vector<16x64xf32>
    %c2 = arith.constant 2 : index
    %c0_47 = arith.constant 0 : index
    %c0_48 = arith.constant 0 : index
    %80 = vector.load %arg12[%c2, %c0_47, %c0_48] : memref<9x16x64xbf16, #tpu.memory_space<vmem>>, vector<1x16x64xbf16>
    %81 = vector.shape_cast %80 : vector<1x16x64xbf16> to vector<16x64xbf16>
    %cst_49 = arith.constant dense<0.000000e+00> : vector<16x64xf32>
    %82 = tpu.matmul %73, %81, %cst_49 {dimension_numbers = #tpu.dot_dimension_numbers<[1], [0], [0], [1], [0, 0, 1, 1], [], []>} : vector<16x16xbf16>, vector<16x64xbf16>, vector<16x64xf32> -> vector<16x64xf32>
    %c3 = arith.constant 3 : index
    %c0_50 = arith.constant 0 : index
    %c0_51 = arith.constant 0 : index
    %83 = vector.load %arg12[%c3, %c0_50, %c0_51] : memref<9x16x64xbf16, #tpu.memory_space<vmem>>, vector<1x16x64xbf16>
    %84 = vector.shape_cast %83 : vector<1x16x64xbf16> to vector<16x64xbf16>
    %cst_52 = arith.constant dense<0.000000e+00> : vector<16x64xf32>
    %85 = tpu.matmul %73, %84, %cst_52 {dimension_numbers = #tpu.dot_dimension_numbers<[1], [0], [0], [1], [0, 0, 1, 1], [], []>} : vector<16x16xbf16>, vector<16x64xbf16>, vector<16x64xf32> -> vector<16x64xf32>
    %c4 = arith.constant 4 : index
    %c0_53 = arith.constant 0 : index
    %c0_54 = arith.constant 0 : index
    %86 = vector.load %arg12[%c4, %c0_53, %c0_54] : memref<9x16x64xbf16, #tpu.memory_space<vmem>>, vector<1x16x64xbf16>
    %87 = vector.shape_cast %86 : vector<1x16x64xbf16> to vector<16x64xbf16>
    %cst_55 = arith.constant dense<0.000000e+00> : vector<16x64xf32>
    %88 = tpu.matmul %73, %87, %cst_55 {dimension_numbers = #tpu.dot_dimension_numbers<[1], [0], [0], [1], [0, 0, 1, 1], [], []>} : vector<16x16xbf16>, vector<16x64xbf16>, vector<16x64xf32> -> vector<16x64xf32>
    %c5 = arith.constant 5 : index
    %c0_56 = arith.constant 0 : index
    %c0_57 = arith.constant 0 : index
    %89 = vector.load %arg12[%c5, %c0_56, %c0_57] : memref<9x16x64xbf16, #tpu.memory_space<vmem>>, vector<1x16x64xbf16>
    %90 = vector.shape_cast %89 : vector<1x16x64xbf16> to vector<16x64xbf16>
    %cst_58 = arith.constant dense<0.000000e+00> : vector<16x64xf32>
    %91 = tpu.matmul %73, %90, %cst_58 {dimension_numbers = #tpu.dot_dimension_numbers<[1], [0], [0], [1], [0, 0, 1, 1], [], []>} : vector<16x16xbf16>, vector<16x64xbf16>, vector<16x64xf32> -> vector<16x64xf32>
    %c6 = arith.constant 6 : index
    %c0_59 = arith.constant 0 : index
    %c0_60 = arith.constant 0 : index
    %92 = vector.load %arg12[%c6, %c0_59, %c0_60] : memref<9x16x64xbf16, #tpu.memory_space<vmem>>, vector<1x16x64xbf16>
    %93 = vector.shape_cast %92 : vector<1x16x64xbf16> to vector<16x64xbf16>
    %cst_61 = arith.constant dense<0.000000e+00> : vector<16x64xf32>
    %94 = tpu.matmul %73, %93, %cst_61 {dimension_numbers = #tpu.dot_dimension_numbers<[1], [0], [0], [1], [0, 0, 1, 1], [], []>} : vector<16x16xbf16>, vector<16x64xbf16>, vector<16x64xf32> -> vector<16x64xf32>
    %c7 = arith.constant 7 : index
    %c0_62 = arith.constant 0 : index
    %c0_63 = arith.constant 0 : index
    %95 = vector.load %arg12[%c7, %c0_62, %c0_63] : memref<9x16x64xbf16, #tpu.memory_space<vmem>>, vector<1x16x64xbf16>
    %96 = vector.shape_cast %95 : vector<1x16x64xbf16> to vector<16x64xbf16>
    %cst_64 = arith.constant dense<0.000000e+00> : vector<16x64xf32>
    %97 = tpu.matmul %73, %96, %cst_64 {dimension_numbers = #tpu.dot_dimension_numbers<[1], [0], [0], [1], [0, 0, 1, 1], [], []>} : vector<16x16xbf16>, vector<16x64xbf16>, vector<16x64xf32> -> vector<16x64xf32>
    %c8 = arith.constant 8 : index
    %c0_65 = arith.constant 0 : index
    %c0_66 = arith.constant 0 : index
    %98 = vector.load %arg12[%c8, %c0_65, %c0_66] : memref<9x16x64xbf16, #tpu.memory_space<vmem>>, vector<1x16x64xbf16>
    %99 = vector.shape_cast %98 : vector<1x16x64xbf16> to vector<16x64xbf16>
    %cst_67 = arith.constant dense<0.000000e+00> : vector<16x64xf32>
    %100 = tpu.matmul %73, %99, %cst_67 {dimension_numbers = #tpu.dot_dimension_numbers<[1], [0], [0], [1], [0, 0, 1, 1], [], []>} : vector<16x16xbf16>, vector<16x64xbf16>, vector<16x64xf32> -> vector<16x64xf32>
    %101 = tpu.concatenate %76, %79, %82, %85, %88, %91, %94, %97, %100 in 0 : vector<16x64xf32>, vector<16x64xf32>, vector<16x64xf32>, vector<16x64xf32>, vector<16x64xf32>, vector<16x64xf32>, vector<16x64xf32>, vector<16x64xf32>, vector<16x64xf32> -> vector<144x64xf32>
    %102 = arith.truncf %101 : vector<144x64xf32> to vector<144x64xbf16>
    %c0_68 = arith.constant 0 : index
    %c0_69 = arith.constant 0 : index
    %103 = vector.load %arg13[%c0_68, %c0_69] : memref<8x144xbf16, #tpu.memory_space<vmem>>, vector<8x144xbf16>
    %cst_70 = arith.constant dense<0.000000e+00> : vector<8x64xf32>
    %104 = tpu.matmul %103, %102, %cst_70 {dimension_numbers = #tpu.dot_dimension_numbers<[1], [0], [0], [1], [0, 0, 1, 1], [], []>} : vector<8x144xbf16>, vector<144x64xbf16>, vector<8x64xf32> -> vector<8x64xf32>
    %c0_71 = arith.constant 0 : index
    %c0_72 = arith.constant 0 : index
    %105 = vector.load %arg14[%c0_71, %c0_72] : memref<8x1xf32, #tpu.memory_space<vmem>>, vector<8x1xf32>
    %106 = vector.broadcast %105 : vector<8x1xf32> to vector<8x64xf32>
    %107 = arith.addf %104, %106 : vector<8x64xf32>
    %cst_73 = arith.constant dense<0.000000e+00> : vector<8xf32>
    %108 = vector.multi_reduction <add>, %107, %cst_73 [1] : vector<8x64xf32> to vector<8xf32>
    %109 = vector.shape_cast %108 : vector<8xf32> to vector<8x1xf32>
    %cst_74 = arith.constant dense<0.000000e+00> : vector<1xf32>
    %110 = vector.multi_reduction <add>, %109, %cst_74 [0] : vector<8x1xf32> to vector<1xf32>
    %111 = vector.shape_cast %110 : vector<1xf32> to vector<1x1xf32>
    %cst_75 = arith.constant 5.120000e+02 : f32
    %112 = vector.broadcast %cst_75 : f32 to vector<1x1xf32>
    %113 = arith.divf %111, %112 : vector<1x1xf32>
    %114 = vector.broadcast %113 : vector<1x1xf32> to vector<8x64xf32>
    %115 = arith.subf %107, %114 : vector<8x64xf32>
    %116 = arith.mulf %115, %115 : vector<8x64xf32>
    %cst_76 = arith.constant dense<0.000000e+00> : vector<8xf32>
    %117 = vector.multi_reduction <add>, %116, %cst_76 [1] : vector<8x64xf32> to vector<8xf32>
    %118 = vector.shape_cast %117 : vector<8xf32> to vector<8x1xf32>
    %cst_77 = arith.constant dense<0.000000e+00> : vector<1xf32>
    %119 = vector.multi_reduction <add>, %118, %cst_77 [0] : vector<8x1xf32> to vector<1xf32>
    %120 = vector.shape_cast %119 : vector<1xf32> to vector<1x1xf32>
    %cst_78 = arith.constant 5.120000e+02 : f32
    %121 = vector.broadcast %cst_78 : f32 to vector<1x1xf32>
    %122 = arith.divf %120, %121 : vector<1x1xf32>
    %cst_79 = arith.constant 9.99999974E-6 : f32
    %123 = vector.broadcast %cst_79 : f32 to vector<1x1xf32>
    %124 = arith.addf %122, %123 : vector<1x1xf32>
    %125 = math.rsqrt %124 : vector<1x1xf32>
    %126 = vector.broadcast %125 : vector<1x1xf32> to vector<8x64xf32>
    %127 = arith.mulf %115, %126 : vector<8x64xf32>
    %c0_80 = arith.constant 0 : index
    %c0_81 = arith.constant 0 : index
    %128 = vector.load %arg15[%c0_80, %c0_81] : memref<8x1xf32, #tpu.memory_space<vmem>>, vector<8x1xf32>
    %129 = vector.broadcast %128 : vector<8x1xf32> to vector<8x64xf32>
    %130 = arith.mulf %127, %129 : vector<8x64xf32>
    %c0_82 = arith.constant 0 : index
    %c0_83 = arith.constant 0 : index
    %131 = vector.load %arg16[%c0_82, %c0_83] : memref<8x1xf32, #tpu.memory_space<vmem>>, vector<8x1xf32>
    %132 = vector.broadcast %131 : vector<8x1xf32> to vector<8x64xf32>
    %133 = arith.addf %130, %132 : vector<8x64xf32>
    %cst_84 = arith.constant 0.000000e+00 : f32
    %134 = vector.broadcast %cst_84 : f32 to vector<8x64xf32>
    %135 = arith.maximumf %133, %134 : vector<8x64xf32>
    %136 = arith.truncf %135 : vector<8x64xf32> to vector<8x64xbf16>
    %c0_85 = arith.constant 0 : index
    %c0_86 = arith.constant 0 : index
    %c0_87 = arith.constant 0 : index
    %137 = vector.load %arg17[%c0_85, %c0_86, %c0_87] : memref<9x64x256xbf16, #tpu.memory_space<vmem>>, vector<1x64x256xbf16>
    %138 = vector.shape_cast %137 : vector<1x64x256xbf16> to vector<64x256xbf16>
    %cst_88 = arith.constant dense<0.000000e+00> : vector<8x256xf32>
    %139 = tpu.matmul %136, %138, %cst_88 {dimension_numbers = #tpu.dot_dimension_numbers<[1], [0], [0], [1], [0, 0, 1, 1], [], []>} : vector<8x64xbf16>, vector<64x256xbf16>, vector<8x256xf32> -> vector<8x256xf32>
    %c1_89 = arith.constant 1 : index
    %c0_90 = arith.constant 0 : index
    %c0_91 = arith.constant 0 : index
    %140 = vector.load %arg17[%c1_89, %c0_90, %c0_91] : memref<9x64x256xbf16, #tpu.memory_space<vmem>>, vector<1x64x256xbf16>
    %141 = vector.shape_cast %140 : vector<1x64x256xbf16> to vector<64x256xbf16>
    %cst_92 = arith.constant dense<0.000000e+00> : vector<8x256xf32>
    %142 = tpu.matmul %136, %141, %cst_92 {dimension_numbers = #tpu.dot_dimension_numbers<[1], [0], [0], [1], [0, 0, 1, 1], [], []>} : vector<8x64xbf16>, vector<64x256xbf16>, vector<8x256xf32> -> vector<8x256xf32>
    %c2_93 = arith.constant 2 : index
    %c0_94 = arith.constant 0 : index
    %c0_95 = arith.constant 0 : index
    %143 = vector.load %arg17[%c2_93, %c0_94, %c0_95] : memref<9x64x256xbf16, #tpu.memory_space<vmem>>, vector<1x64x256xbf16>
    %144 = vector.shape_cast %143 : vector<1x64x256xbf16> to vector<64x256xbf16>
    %cst_96 = arith.constant dense<0.000000e+00> : vector<8x256xf32>
    %145 = tpu.matmul %136, %144, %cst_96 {dimension_numbers = #tpu.dot_dimension_numbers<[1], [0], [0], [1], [0, 0, 1, 1], [], []>} : vector<8x64xbf16>, vector<64x256xbf16>, vector<8x256xf32> -> vector<8x256xf32>
    %c3_97 = arith.constant 3 : index
    %c0_98 = arith.constant 0 : index
    %c0_99 = arith.constant 0 : index
    %146 = vector.load %arg17[%c3_97, %c0_98, %c0_99] : memref<9x64x256xbf16, #tpu.memory_space<vmem>>, vector<1x64x256xbf16>
    %147 = vector.shape_cast %146 : vector<1x64x256xbf16> to vector<64x256xbf16>
    %cst_100 = arith.constant dense<0.000000e+00> : vector<8x256xf32>
    %148 = tpu.matmul %136, %147, %cst_100 {dimension_numbers = #tpu.dot_dimension_numbers<[1], [0], [0], [1], [0, 0, 1, 1], [], []>} : vector<8x64xbf16>, vector<64x256xbf16>, vector<8x256xf32> -> vector<8x256xf32>
    %c4_101 = arith.constant 4 : index
    %c0_102 = arith.constant 0 : index
    %c0_103 = arith.constant 0 : index
    %149 = vector.load %arg17[%c4_101, %c0_102, %c0_103] : memref<9x64x256xbf16, #tpu.memory_space<vmem>>, vector<1x64x256xbf16>
    %150 = vector.shape_cast %149 : vector<1x64x256xbf16> to vector<64x256xbf16>
    %cst_104 = arith.constant dense<0.000000e+00> : vector<8x256xf32>
    %151 = tpu.matmul %136, %150, %cst_104 {dimension_numbers = #tpu.dot_dimension_numbers<[1], [0], [0], [1], [0, 0, 1, 1], [], []>} : vector<8x64xbf16>, vector<64x256xbf16>, vector<8x256xf32> -> vector<8x256xf32>
    %c5_105 = arith.constant 5 : index
    %c0_106 = arith.constant 0 : index
    %c0_107 = arith.constant 0 : index
    %152 = vector.load %arg17[%c5_105, %c0_106, %c0_107] : memref<9x64x256xbf16, #tpu.memory_space<vmem>>, vector<1x64x256xbf16>
    %153 = vector.shape_cast %152 : vector<1x64x256xbf16> to vector<64x256xbf16>
    %cst_108 = arith.constant dense<0.000000e+00> : vector<8x256xf32>
    %154 = tpu.matmul %136, %153, %cst_108 {dimension_numbers = #tpu.dot_dimension_numbers<[1], [0], [0], [1], [0, 0, 1, 1], [], []>} : vector<8x64xbf16>, vector<64x256xbf16>, vector<8x256xf32> -> vector<8x256xf32>
    %c6_109 = arith.constant 6 : index
    %c0_110 = arith.constant 0 : index
    %c0_111 = arith.constant 0 : index
    %155 = vector.load %arg17[%c6_109, %c0_110, %c0_111] : memref<9x64x256xbf16, #tpu.memory_space<vmem>>, vector<1x64x256xbf16>
    %156 = vector.shape_cast %155 : vector<1x64x256xbf16> to vector<64x256xbf16>
    %cst_112 = arith.constant dense<0.000000e+00> : vector<8x256xf32>
    %157 = tpu.matmul %136, %156, %cst_112 {dimension_numbers = #tpu.dot_dimension_numbers<[1], [0], [0], [1], [0, 0, 1, 1], [], []>} : vector<8x64xbf16>, vector<64x256xbf16>, vector<8x256xf32> -> vector<8x256xf32>
    %c7_113 = arith.constant 7 : index
    %c0_114 = arith.constant 0 : index
    %c0_115 = arith.constant 0 : index
    %158 = vector.load %arg17[%c7_113, %c0_114, %c0_115] : memref<9x64x256xbf16, #tpu.memory_space<vmem>>, vector<1x64x256xbf16>
    %159 = vector.shape_cast %158 : vector<1x64x256xbf16> to vector<64x256xbf16>
    %cst_116 = arith.constant dense<0.000000e+00> : vector<8x256xf32>
    %160 = tpu.matmul %136, %159, %cst_116 {dimension_numbers = #tpu.dot_dimension_numbers<[1], [0], [0], [1], [0, 0, 1, 1], [], []>} : vector<8x64xbf16>, vector<64x256xbf16>, vector<8x256xf32> -> vector<8x256xf32>
    %c8_117 = arith.constant 8 : index
    %c0_118 = arith.constant 0 : index
    %c0_119 = arith.constant 0 : index
    %161 = vector.load %arg17[%c8_117, %c0_118, %c0_119] : memref<9x64x256xbf16, #tpu.memory_space<vmem>>, vector<1x64x256xbf16>
    %162 = vector.shape_cast %161 : vector<1x64x256xbf16> to vector<64x256xbf16>
    %cst_120 = arith.constant dense<0.000000e+00> : vector<8x256xf32>
    %163 = tpu.matmul %136, %162, %cst_120 {dimension_numbers = #tpu.dot_dimension_numbers<[1], [0], [0], [1], [0, 0, 1, 1], [], []>} : vector<8x64xbf16>, vector<64x256xbf16>, vector<8x256xf32> -> vector<8x256xf32>
    %164 = tpu.concatenate %139, %142, %145, %148, %151, %154, %157, %160, %163 in 0 : vector<8x256xf32>, vector<8x256xf32>, vector<8x256xf32>, vector<8x256xf32>, vector<8x256xf32>, vector<8x256xf32>, vector<8x256xf32>, vector<8x256xf32>, vector<8x256xf32> -> vector<72x256xf32>
    %165 = arith.truncf %164 : vector<72x256xf32> to vector<72x256xbf16>
    %c0_121 = arith.constant 0 : index
    %c0_122 = arith.constant 0 : index
    %166 = vector.load %arg18[%c0_121, %c0_122] : memref<3x72xbf16, #tpu.memory_space<vmem>>, vector<3x72xbf16>
    %cst_123 = arith.constant dense<0.000000e+00> : vector<3x256xf32>
    %167 = tpu.matmul %166, %165, %cst_123 {dimension_numbers = #tpu.dot_dimension_numbers<[1], [0], [0], [1], [0, 0, 1, 1], [], []>} : vector<3x72xbf16>, vector<72x256xbf16>, vector<3x256xf32> -> vector<3x256xf32>
    %c0_124 = arith.constant 0 : index
    %c0_125 = arith.constant 0 : index
    %168 = vector.load %arg19[%c0_124, %c0_125] : memref<3x1xf32, #tpu.memory_space<vmem>>, vector<3x1xf32>
    %169 = vector.broadcast %168 : vector<3x1xf32> to vector<3x256xf32>
    %170 = arith.addf %167, %169 : vector<3x256xf32>
    %c0_126 = arith.constant 0 : index
    %c0_127 = arith.constant 0 : index
    %c0_128 = arith.constant 0 : index
    %171 = vector.load %arg20[%c0_126, %c0_127, %c0_128] : memref<1x3x256xf32, #tpu.memory_space<vmem>>, vector<1x3x256xf32>
    %172 = vector.shape_cast %171 : vector<1x3x256xf32> to vector<3x256xf32>
    %173 = vector.shape_cast %170 : vector<3x256xf32> to vector<1x3x256xf32>
    tpu.vector_store %arg20[%c0_126, %c0_127, %c0_128], %173 {strides = array<i32>} : memref<1x3x256xf32, #tpu.memory_space<vmem>>, vector<1x3x256xf32>,
    return
  }
  func.func @transform_0(%arg0: i32) -> (i32, i32, i32) {
    %c0_i32 = arith.constant 0 : i32
    %c0_i32_0 = arith.constant 0 : i32
    %c0_i32_1 = arith.constant 0 : i32
    return %arg0, %c0_i32, %c0_i32_0 : i32, i32, i32
  }
  func.func @transform_1(%arg0: i32) -> (i32, i32) {
    %c0_i32 = arith.constant 0 : i32
    %c0_i32_0 = arith.constant 0 : i32
    %c0_i32_1 = arith.constant 0 : i32
    return %c0_i32, %c0_i32_0 : i32, i32
  }
  func.func @transform_2(%arg0: i32) -> (i32, i32) {
    %c0_i32 = arith.constant 0 : i32
    %c0_i32_0 = arith.constant 0 : i32
    %c0_i32_1 = arith.constant 0 : i32
    return %c0_i32, %c0_i32_0 : i32, i32
  }
  func.func @transform_3(%arg0: i32) -> (i32, i32) {
    %c0_i32 = arith.constant 0 : i32
    %c0_i32_0 = arith.constant 0 : i32
    %c0_i32_1 = arith.constant 0 : i32
    return %c0_i32, %c0_i32_0 : i32, i32
  }
  func.func @transform_4(%arg0: i32) -> (i32, i32) {
    %c0_i32 = arith.constant 0 : i32
    %c0_i32_0 = arith.constant 0 : i32
    %c0_i32_1 = arith.constant 0 : i32
    return %c0_i32, %c0_i32_0 : i32, i32
  }
  func.func @transform_5(%arg0: i32) -> (i32, i32) {
    %c0_i32 = arith.constant 0 : i32
    %c0_i32_0 = arith.constant 0 : i32
    %c0_i32_1 = arith.constant 0 : i32
    return %c0_i32, %c0_i32_0 : i32, i32
  }
  func.func @transform_6(%arg0: i32) -> (i32, i32) {
    %c0_i32 = arith.constant 0 : i32
    %c0_i32_0 = arith.constant 0 : i32
    %c0_i32_1 = arith.constant 0 : i32
    return %c0_i32, %c0_i32_0 : i32, i32
  }
  func.func @transform_7(%arg0: i32) -> (i32, i32) {
    %c0_i32 = arith.constant 0 : i32
    %c0_i32_0 = arith.constant 0 : i32
    %c0_i32_1 = arith.constant 0 : i32
    return %c0_i32, %c0_i32_0 : i32, i32
  }
  func.func @transform_8(%arg0: i32) -> (i32, i32) {
    %c0_i32 = arith.constant 0 : i32
    %c0_i32_0 = arith.constant 0 : i32
    %c0_i32_1 = arith.constant 0 : i32
    return %c0_i32, %c0_i32_0 : i32, i32
  }
  func.func @transform_9(%arg0: i32) -> (i32, i32) {
    %c0_i32 = arith.constant 0 : i32
    %c0_i32_0 = arith.constant 0 : i32
    %c0_i32_1 = arith.constant 0 : i32
    return %c0_i32, %c0_i32_0 : i32, i32
  }
  func.func @transform_10(%arg0: i32) -> (i32, i32) {
    %c0_i32 = arith.constant 0 : i32
    %c0_i32_0 = arith.constant 0 : i32
    %c0_i32_1 = arith.constant 0 : i32
    return %c0_i32, %c0_i32_0 : i32, i32
  }
  func.func @transform_11(%arg0: i32) -> (i32, i32, i32) {
    %c0_i32 = arith.constant 0 : i32
    %c0_i32_0 = arith.constant 0 : i32
    %c0_i32_1 = arith.constant 0 : i32
    %c0_i32_2 = arith.constant 0 : i32
    return %c0_i32, %c0_i32_0, %c0_i32_1 : i32, i32, i32
  }
  func.func @transform_12(%arg0: i32) -> (i32, i32) {
    %c0_i32 = arith.constant 0 : i32
    %c0_i32_0 = arith.constant 0 : i32
    %c0_i32_1 = arith.constant 0 : i32
    return %c0_i32, %c0_i32_0 : i32, i32
  }
  func.func @transform_13(%arg0: i32) -> (i32, i32) {
    %c0_i32 = arith.constant 0 : i32
    %c0_i32_0 = arith.constant 0 : i32
    %c0_i32_1 = arith.constant 0 : i32
    return %c0_i32, %c0_i32_0 : i32, i32
  }
  func.func @transform_14(%arg0: i32) -> (i32, i32) {
    %c0_i32 = arith.constant 0 : i32
    %c0_i32_0 = arith.constant 0 : i32
    %c0_i32_1 = arith.constant 0 : i32
    return %c0_i32, %c0_i32_0 : i32, i32
  }
  func.func @transform_15(%arg0: i32) -> (i32, i32) {
    %c0_i32 = arith.constant 0 : i32
    %c0_i32_0 = arith.constant 0 : i32
    %c0_i32_1 = arith.constant 0 : i32
    return %c0_i32, %c0_i32_0 : i32, i32
  }
  func.func @transform_16(%arg0: i32) -> (i32, i32, i32) {
    %c0_i32 = arith.constant 0 : i32
    %c0_i32_0 = arith.constant 0 : i32
    %c0_i32_1 = arith.constant 0 : i32
    %c0_i32_2 = arith.constant 0 : i32
    return %c0_i32, %c0_i32_0, %c0_i32_1 : i32, i32, i32
  }
  func.func @transform_17(%arg0: i32) -> (i32, i32) {
    %c0_i32 = arith.constant 0 : i32
    %c0_i32_0 = arith.constant 0 : i32
    %c0_i32_1 = arith.constant 0 : i32
    return %c0_i32, %c0_i32_0 : i32, i32
  }
  func.func @transform_18(%arg0: i32) -> (i32, i32) {
    %c0_i32 = arith.constant 0 : i32
    %c0_i32_0 = arith.constant 0 : i32
    %c0_i32_1 = arith.constant 0 : i32
    return %c0_i32, %c0_i32_0 : i32, i32
  }
  func.func @transform_19(%arg0: i32) -> (i32, i32, i32) {
    %c0_i32 = arith.constant 0 : i32
    %c0_i32_0 = arith.constant 0 : i32
    %c0_i32_1 = arith.constant 0 : i32
    return %arg0, %c0_i32, %c0_i32_0 : i32, i32, i32
  }
}

</mosaic_0001>

<bundles_post_ra>
// kernel: _forward_impl.1
= control target key start
LH: loop header
LB: loop body
LE: loop exit
PB: predicated region body
PF: predicated region fallthrough
CT: control target
= control target key end

     0   :  { %s3598_s0 = inlined_call_operand.vmem [shape: f32[2,1,16], index: 0, kind: input, shape index: {}]   ;;  %s3599_s1 = inlined_call_operand.vmem [shape: bf16[16,32], index: 1, kind: input, shape index: {}]   ;;  %s3600_s2 = inlined_call_operand.vmem [shape: f32[1,32], index: 2, kind: input, shape index: {}, may-alias: {2,4}]   ;;  %s3601_s3 = inlined_call_operand.vmem [shape: f32[1,32], index: 3, kind: input, shape index: {}]   ;;  %s3602_s4 = inlined_call_operand.vmem [shape: f32[1,32], index: 4, kind: input, shape index: {}, may-alias: {2,4}]   ;;  %s3603_s5 = inlined_call_operand.vmem [shape: bf16[32,256], index: 5, kind: input, shape index: {}]   ;;  %s3604_s6 = inlined_call_operand.vmem [shape: f32[1,256], index: 6, kind: input, shape index: {}, may-alias: {6,8}]   ;;  %s3605_s7 = inlined_call_operand.vmem [shape: f32[1,256], index: 7, kind: input, shape index: {}]   ;;  %s3606_s8 = inlined_call_operand.vmem [shape: f32[1,256], index: 8, kind: input, shape index: {}, may-alias: {6,8}]   ;;  %s3607_s9 = inlined_call_operand.vmem [shape: bf16[16,256], index: 9, kind: input, shape index: {}]   ;;  %s3608_s10 = inlined_call_operand.vmem [shape: bf16[256,16], index: 10, kind: input, shape index: {}]   ;;  %s3609_s11 = inlined_call_operand.vmem [shape: bf16[9,16,64], index: 11, kind: input, shape index: {}]   ;;  %s3610_s12 = inlined_call_operand.vmem [shape: bf16[8,144], index: 12, kind: input, shape index: {}]   ;;  %s3611_s13 = inlined_call_operand.vmem [shape: f32[8,1], index: 13, kind: input, shape index: {}, may-alias: {13,15}]   ;;  %s3612_s14 = inlined_call_operand.vmem [shape: f32[8,1], index: 14, kind: input, shape index: {}]   ;;  %s3613_s15 = inlined_call_operand.vmem [shape: f32[8,1], index: 15, kind: input, shape index: {}, may-alias: {13,15}]   ;;  %s3614_s16 = inlined_call_operand.vmem [shape: bf16[9,64,256], index: 16, kind: input, shape index: {}]   ;;  %s3615_s17 = inlined_call_operand.vmem [shape: bf16[3,72], index: 17, kind: input, shape index: {}]   ;;  %s3616_s18 = inlined_call_operand.vmem [shape: f32[3,1], index: 18, kind: input, shape index: {}]   ;;  %s3617_s19 = inlined_call_operand.vmem [shape: f32[2,3,256], index: 19, kind: output, shape index: {}]  }
   0x1   :  { %3618 = sst [smem:[#allocation3_spill]] %s3598_s0  ;;  %s3115_s0 = smov 0  }
   0x2   :  { %3619 = sst [smem:[#allocation4_spill]] %s3599_s1 }
   0x3   :  { %3620 = sst [smem:[#allocation5_spill]] %s3600_s2 }
   0x4   :  { %3621 = sst [smem:[#allocation6_spill]] %s3601_s3 }
   0x5 LB: > { %s2522_s30 = sadd.s32 4294967295, %s3009_s0   ;;  %p2526_p0 = scmp.ge.s32.totalorder %s3009_s0, 1  ;;  %s3009_s0 = sphi %s3115_s0, %s29_s0  }
   0x6   : > { %p535_p1 = scmp.lt.s32.totalorder %s3009_s0, 3 }
   0x8   : > { %p536_p2 = pnand %p2526_p0, %p535_p1 }
   0x9   : > { %s3622_s1 = sld [smem:[#allocation4_spill]] (!%p536_p2)  ;;  %v3011_v1 = vmov (!%p536_p2), 0.0   ;;  %p589_p3 = scmp.lt.s32.totalorder (!%p536_p2), %s2522_s30, 1  ;;  %vm3012_vm0 = vmmov (!%p536_p2), 0   ;;  %vm609_vm1 = vcmask (!%p536_p2), 130048   ;;  %vm653_vm2 = vcmask (!%p536_p2), 253952  }
   0xa   : > { %539 = sbr.rel (%p536_p2) target bundleno = 2662 (0xa66), region = 96  ;;  %2781 = vmatprep.subr.bf16.mxu0 (!%p536_p2), %v3011_v1  ;;  %2783 = vmatprep.mubr.msk.bf16.mxu0 (!%p536_p2), %vm3012_vm0, %v3011_v1  ;;  %s3623_s23 = sld [smem:[#allocation3_spill]] (!%p536_p2)  ;;  %v2856_v16 = vld [vmem:[%s3603_s5 + $0x4] ss:$8 sps:$4 sm:$0xff] (!%p536_p2)   ;;  %v2858_v17 = vld [vmem:[%s3603_s5] ss:$8 sps:$4 sm:$0xff] (!%p536_p2)   ;;  %v700_v32 = vlaneseq (!%p536_p2) }
   0xb   : > { %s3624_s26 = sld [smem:[#allocation5_spill]] (!%p536_p2)  ;;  %v2859_v18 = vld [vmem:[%s3603_s5 + $0x14] ss:$8 sps:$4 sm:$0xff] (!%p536_p2)   ;;  %714 = vmatprep.subr.bf16.mxu1 (!%p536_p2), %v2856_v16  ;;  %v3013_v19 = vmov (!%p536_p2), 0   ;;  %v2861_v20 = vld [vmem:[%s3603_s5 + $0x10] ss:$8 sps:$4 sm:$0xff] (!%p536_p2)  }
   0xc   : > { %746 = vmatprep.mubr.bf16.mxu1 (!%p536_p2), %v3013_v19  ;;  %715 = vmatpush1.bf16.msra.mxu1 (!%p536_p2), %v2858_v17  ;;  %s3625_s25 = sld [smem:[#allocation6_spill]] (!%p536_p2)  ;;  %v670_v27 = vld [vmem:[%s3602_s4] sm:$0x1] (!%p536_p2)  ;;  %vm710_vm3 = vcmask (!%p536_p2), 261120   ;;  %v3164_v33 = vshrl.u32 (!%p536_p2), %v700_v32, 7  ;;  %vm755_vm4 = vcmask (!%p536_p2), 1040384  }
   0xd   : > { %2853 = vset.pattern.permute.xlu0 (!%p536_p2), %v3013_v19  ;;  %716 = vmatprep.subr.bf16.mxu1 (!%p536_p2), %v2859_v18  ;;  %v678_v35 = vld [vmem:[%s3604_s6] sm:$0x3] (!%p536_p2)  ;;  %v2864_v59 = vld [vmem:[%s3608_s10 + $0x48] sm:$0xff] (!%p536_p2)   ;;  %v2866_v61 = vld [vmem:[%s3608_s10 + $0x50] sm:$0xff] (!%p536_p2)   ;;  %vm827_vm5 = vcmp.lt.s32.totalorder (!%p536_p2), %v700_v32, 256  ;;  %vm1541_vm6 = vcmask (!%p536_p2), 523264  }
   0xe   : > { %2854 = vset.pattern.permute.xlu1 (!%p536_p2), %v3013_v19  ;;  %v3167_v34 = vsub.s32 (!%p536_p2), 0, %v3164_v33  ;;  %v3173_v36 = vsub.s32 (!%p536_p2), 1, %v3164_v33  ;;  %v2862_v57 = vld [vmem:[%s3608_s10 + $0x40] sm:$0xff] (!%p536_p2)   ;;  %v2865_v60 = vld [vmem:[%s3608_s10 + $0x8] sm:$0xff] (!%p536_p2)   ;;  %v2867_v62 = vld [vmem:[%s3608_s10 + $0x10] sm:$0xff] (!%p536_p2)   ;;  %vm2417_vm7 = vcmask (!%p536_p2), 1043456  }
   0xf   : > { %v2855_v0 = vld [vmem:[%s3622_s1] sm:$0xff] (!%p536_p2)   ;;  %v2868_v63 = vld [vmem:[%s3608_s10 + $0x58] sm:$0xff] (!%p536_p2)   ;;  %vm2413_vm8 = vcmask (!%p536_p2), 588800  }
  0x10   : > { %2782 = vmatpush3.bf16.msra.mxu0 (!%p536_p2), %v2855_v0  ;;  %717 = vmatpush1.bf16.msra.mxu1 (!%p536_p2), %v2861_v20  ;;  %v703_v37 = vrot.slane (!%p536_p2), %v678_v35, %v3167_v34  ;;  %v707_v38 = vrot.slane (!%p536_p2), %v678_v35, %v3173_v36  ;;  %v2863_v58 = vld [vmem:[%s3608_s10] sm:$0xff] (!%p536_p2)   ;;  %v2869_v0 = vld [vmem:[%s3608_s10 + $0x18] sm:$0xff] (!%p536_p2)  }
  0x11   : > { %s3627_s30 = smov (!%p589_p3, %s2522_s30), 1  ;;  %v602_v4 = vld [vmem:[%s3624_s26] sm:$0x1]  ;;  %2787 = vmatprep.subr.bf16.mxu1 %v3011_v1  ;;  %2741 = vmatprep.subr.bf16.mxu0 %v2862_v57 }
  0x12   : > { %s591_s24 = scalar_lea.vmem %s3623_s23, %s3627_s30  ;;  %v668_v25 = vld [vmem:[%s3625_s25] sm:$0x1]  ;;  %s2738_s23 = sshll.u32 %s3627_s30, 3 }
  0x13   : > { %v598_v2 = vld [vmem:[%s591_s24] sm:$0x1]  ;;  %s596_s3 = scalar_lea.vmem %s3617_s19, %s2738_s23 }
  0x14   : > { %v599_v3 = vpack.c.bf16 %v598_v2, %v598_v2  ;;  %v2870_v2 = vld [vmem:[%s3608_s10 + $0x60] sm:$0xff]  }
  0x16   : > { %2784 = vmatmul.mubr.msk.bf16.vlgmr.msra.gmra.mrb[0].mxu0 %vm609_vm1, %v599_v3  ;;  %v2871_v3 = vld [vmem:[%s3608_s10 + $0x20] sm:$0xff]  }
  0x17   : > { %2742 = vmatpush3.bf16.msra.mxu0 %v2863_v58 }
  0x18   : > { %2743 = vmatprep.subr.bf16.mxu0 %v2864_v59  ;;  %v2880_v59 = vld [vmem:[%s3609_s11 + $0x8] sm:$0xff]  }
  0x1b   : > { %2744 = vmatpush3.bf16.msra.mxu0 %v2865_v60  ;;  %v2881_v60 = vld [vmem:[%s3609_s11 + $0x30] sm:$0xff]  }
  0x1c   : > { %2745 = vmatprep.subr.bf16.mxu0 %v2866_v61 }
  0x1f   : > { %2746 = vmatpush3.bf16.msra.mxu0 %v2867_v62  ;;  %v2882_v62 = vld [vmem:[%s3609_s11 + $0x10] sm:$0xff]  }
  0x20   : > { %2747 = vmatprep.subr.bf16.mxu0 %v2868_v63  ;;  %v2883_v63 = vld [vmem:[%s3609_s11 + $0x40] sm:$0xff]  }
  0x23   : > { %2748 = vmatpush3.bf16.msra.mxu0 %v2869_v0  ;;  %v2884_v0 = vld [vmem:[%s3609_s11 + $0x18] sm:$0xff]  }
  0x24   : > { %2749 = vmatprep.subr.bf16.mxu0 %v2870_v2  ;;  %v2885_v2 = vld [vmem:[%s3609_s11 + $0x28] sm:$0xff]  }
  0x27   : > { %2750 = vmatpush3.bf16.msra.mxu0 %v2871_v3  ;;  %v2886_v3 = vld [vmem:[%s3609_s11 + $0x38] sm:$0xff]  }
  0xe9   : > { %v647_v5 = vpop.f32.mrb[0].mxu0 }
  0xea   : > { %v648_v6 = vadd.f32 %v647_v5, %v602_v4  ;;  %v2785_v7 = vpop.f32.mrb[1].mxu0  ;;  %v2872_v4 = vld [vmem:[%s3608_s10 + $0x68] sm:$0xff]  }
  0xeb   : > { %v650_v8 = vpop.f32.mrb[2].mxu0  ;;  %v2873_v5 = vld [vmem:[%s3608_s10 + $0x28] sm:$0xff]   ;;  %2751 = vmatprep.subr.bf16.mxu0 %v2872_v4  ;;  %v2875_v7 = vld [vmem:[%s3608_s10 + $0x30] sm:$0xff]   ;;  %v3314_v4 = vld [vmem:[%s3610_s12] sm:$0xff] }
  0xec   : > { %v2786_v9 = vpop.f32.mrb[3].mxu0  ;;  %v654_v10 = vsel %vm653_vm2, %v648_v6, 0.0  ;;  %2752 = vmatpush3.bf16.msra.mxu0 %v2873_v5  ;;  %v2876_v8 = vld [vmem:[%s3608_s10 + $0x78] sm:$0xff]   ;;  %v2587_v5 = vcombine.high %v3314_v4, %v3314_v4 }
  0xed   : > { %655 = vadd.xlane.f32.xlu0 %v654_v10  ;;  %v2877_v9 = vld [vmem:[%s3608_s10 + $0x38] sm:$0xff]  }
 0x17a   : > { %v656_v11 = vpop.xlane.xlu0 %655 }
 0x17b   : > { %v658_v12 = vmul.f32 0.03125, %v656_v11 }
 0x17d   : > { %v659_v13 = vsub.f32 %v648_v6, %v658_v12  ;;  %v2874_v6 = vld [vmem:[%s3608_s10 + $0x70] sm:$0xff]  }
 0x17e   : > { %2753 = vmatprep.subr.bf16.mxu0 %v2874_v6  ;;  %v1486_v6 = vld [vmem:[%s3611_s13] sm:$0xff] }
 0x17f   : > { %v660_v14 = vmul.f32 %v659_v13, %v659_v13  ;;  %2754 = vmatpush3.bf16.msra.mxu0 %v2875_v7 }
 0x180   : > { %2755 = vmatprep.subr.bf16.mxu0 %v2876_v8 }
 0x181   : > { %v661_v15 = vsel %vm653_vm2, %v660_v14, 0.0  ;;  %v791_v14 = vld [vmem:[%s3606_s8] sm:$0x3] }
 0x182   : > { %662 = vadd.xlane.f32.xlu0 %v661_v15  ;;  %v3014_v15 = vmov 1966171168  }
 0x183   : > { %2756 = vmatpush3.bf16.msra.mxu0 %v2877_v9  ;;  %v811_v16 = vunpack.c.l.s4 %v3014_v15 }
 0x184   : > { %2811 = vmatprep.subr.bf16.mxu0 %v3011_v1 }
 0x198   : > { %1489 = vperm.xlu0 %2853, %v1486_v6  }
 0x20f   : > { %v663_v21 = vpop.xlane.xlu0 %662 }
 0x210   : > { %v664_v22 = vmul.f32 0.03125, %v663_v21  ;;  %v796_v21 = vrot.slane %v791_v14, %v3167_v34 }
 0x212   : > { %v665_v23 = vadd.f32 1e-05, %v664_v22  ;;  %v800_v22 = vrot.slane %v791_v14, %v3173_v36 }
 0x214   : > { %2997 = vrsqrt.f32 %v665_v23 }
 0x21e   : > { %v2998_v24 = vpop.eup %2997 }
 0x21f   : > { %v667_v26 = vmul.f32 %v2998_v24, %v659_v13  ;;  %v777_v13 = vld [vmem:[%s3605_s7] sm:$0x3] }
 0x220   : > { %v782_v17 = vrot.slane %v777_v13, %v3167_v34  ;;  %v786_v18 = vrot.slane %v777_v13, %v3173_v36 }
 0x221   : > { %v669_v28 = vmul.f32 %v668_v25, %v667_v26  ;;  %v812_v25 = vunpack.c.0.s8 %v811_v16 }
 0x223   : > { %v671_v29 = vadd.f32 %v670_v27, %v669_v28 }
 0x225   : > { %v672_v30 = vmax.f32 %v671_v29, 0.0 }
 0x227   : > { %v673_v31 = vpack.c.bf16 %v672_v30, %v672_v30  ;;  %v815_v30 = vsub.s32 %v812_v25, %v3164_v33 }
 0x229   : > { %2535 = vmatmul.mubr.msk.bf16.vlgmr.msra.gmra.mrb[0].mxu1 %vm710_vm3, %v673_v31 }
 0x22a   : > { %2789 = vmatprep.mubr.msk.bf16.mxu1 %vm3012_vm0, %v3011_v1 }
 0x2fc   : > { %v748_v39 = vpop.f32.mrb[0].mxu1 }
 0x2fd   : > { %v749_v40 = vadd.f32 %v748_v39, %v703_v37  ;;  %v750_v41 = vpop.f32.mrb[1].mxu1 }
 0x2fe   : > { %v751_v42 = vadd.f32 %v750_v41, %v707_v38  ;;  %v752_v43 = vpop.f32.mrb[2].mxu1  ;;  %v832_v41 = vld [vmem:[%s3607_s9 + $0x8] sm:$0xff] }
 0x2ff   : > { %v753_v44 = vpop.f32.mrb[3].mxu1  ;;  %v756_v45 = vsel %vm755_vm4, %v749_v40, 0.0  ;;  %v836_v33 = vunpack.c.h.bf16 %v832_v41 }
 0x300   : > { %v757_v46 = vsel %vm755_vm4, %v751_v42, 0.0  ;;  %v835_v44 = vunpack.c.l.bf16 %v832_v41 }
 0x301   : > { %v758_v47 = vadd.f32 %v757_v46, %v756_v45 }
 0x303   : > { %759 = vadd.xlane.f32.xlu1 %v758_v47 }
 0x390   : > { %v760_v48 = vpop.xlane.xlu1 %759 }
 0x391   : > { %v762_v49 = vmul.f32 0.00390625, %v760_v48 }
 0x393   : > { %v763_v50 = vsub.f32 %v749_v40, %v762_v49  ;;  %v764_v51 = vsub.f32 %v751_v42, %v762_v49  ;;  %v831_v40 = vld [vmem:[%s3607_s9] sm:$0xff] }
 0x394   : > { %v833_v42 = vunpack.c.l.bf16 %v831_v40  ;;  %v834_v43 = vunpack.c.h.bf16 %v831_v40 }
 0x395   : > { %v765_v52 = vmul.f32 %v763_v50, %v763_v50  ;;  %v766_v53 = vmul.f32 %v764_v51, %v764_v51 }
 0x397   : > { %v767_v54 = vsel %vm755_vm4, %v765_v52, 0.0  ;;  %v768_v55 = vsel %vm755_vm4, %v766_v53, 0.0  ;;  %v2878_v53 = vld [vmem:[%s3609_s11] sm:$0xff]  }
 0x398   : > { %v769_v56 = vadd.f32 %v768_v55, %v767_v54  ;;  %2788 = vmatpush3.bf16.msra.mxu1 %v2878_v53 }
 0x399   : > { %2793 = vmatprep.subr.bf16.mxu1 %v3011_v1 }
 0x39a   : > { %770 = vadd.xlane.f32.xlu1 %v769_v56 }
 0x427   : > { %v771_v10 = vpop.xlane.xlu1 %770 }
 0x428   : > { %v772_v11 = vmul.f32 0.00390625, %v771_v10 }
 0x42a   : > { %v773_v12 = vadd.f32 1e-05, %v772_v11 }
 0x42c   : > { %2999 = vrsqrt.f32 %v773_v12 }
 0x436   : > { %v3000_v20 = vpop.eup %2999 }
 0x437   : > { %v775_v23 = vmul.f32 %v3000_v20, %v763_v50  ;;  %v776_v24 = vmul.f32 %v3000_v20, %v764_v51 }
 0x439   : > { %v789_v26 = vmul.f32 %v782_v17, %v775_v23  ;;  %v790_v27 = vmul.f32 %v786_v18, %v776_v24 }
 0x43b   : > { %v803_v28 = vadd.f32 %v796_v21, %v789_v26  ;;  %v804_v29 = vadd.f32 %v800_v22, %v790_v27 }
 0x43d   : > { %v805_v31 = vmax.f32 %v803_v28, 0.0  ;;  %v806_v35 = vmax.f32 %v804_v29, 0.0 }
 0x43f   : > { %v809_v37 = vcombine.low %v805_v31, %v806_v35 }
 0x441   : > { %v816_v38 = vrot.slane %v809_v37, %v815_v30 }
 0x443   : > { %v823_v39 = vrot.slane %v816_v38, %v815_v30 }
 0x445   : > { %829 = vst.msk [vmem:[#allocation2] sm:$0x3] %vm827_vm5, %v823_v39 }
 0x44c   : > { %v830_v45 = vld [vmem:[#allocation2] sm:$0x3] }
 0x44d   : > { %v841_v46 = vrot.slane %v830_v45, %v3167_v34  ;;  %v845_v47 = vrot.slane %v830_v45, %v3173_v36  ;;  %v2879_v34 = vld [vmem:[%s3609_s11 + $0x20] sm:$0xff]  }
 0x44f   : > { %v849_v32 = vmul.f32 %v845_v47, %v834_v43  ;;  %v851_v48 = vmul.f32 %v845_v47, %v836_v33  ;;  %v848_v49 = vmul.f32 %v841_v46, %v833_v42  ;;  %v850_v50 = vmul.f32 %v841_v46, %v835_v44 }
 0x451   : > { %v853_v51 = vpack.c.bf16 %v851_v48, %v849_v32  ;;  %v852_v52 = vpack.c.bf16 %v850_v50, %v848_v49 }
 0x453   : > { %1014 = vmatprep.mubr.bf16.mxu0 %v853_v51 }
 0x454   : > { %1015 = vmatmul.mubr.bf16.vlgmr.msra.gmra.mrb[4].mxu0 %v852_v52 }
 0x455   : > { %2813 = vmatprep.mubr.msk.bf16.mxu0 %vm3012_vm0, %v3011_v1  ;;  %2812 = vmatpush3.bf16.msra.mxu0 %v2879_v34  ;;  %v2586_v34 = vcombine.low %v3314_v4, %v3314_v4 }
 0x456   : > { %2823 = vmatprep.subr.bf16.mxu0 %v3011_v1 }
 0x527   : > { %v2757_v36 = vpop.f32.mrb[4].mxu0 }
 0x528   : > { %v2758_v54 = vpop.f32.mrb[5].mxu0 }
 0x529   : > { %v2759_v55 = vadd.f32 %v2758_v54, %v2757_v36  ;;  %v2760_v56 = vpop.f32.mrb[6].mxu0  ;;  %v1490_v36 = vpop.permute.xlu0 %1489 }
 0x52a   : > { %v2761_v57 = vpop.f32.mrb[7].mxu0 }
 0x52b   : > { %v2762_v58 = vadd.f32 %v2761_v57, %v2760_v56 }
 0x52d   : > { %v1023_v61 = vpack.c.bf16 %v2762_v58, %v2759_v55 }
 0x52f   : > { %2790 = vmatmul.mubr.msk.bf16.vlgmr.msra.gmra.mrb[4].mxu1 %vm609_vm1, %v1023_v61  ;;  %2814 = vmatmul.mubr.msk.bf16.vlgmr.msra.gmra.mrb[8].mxu0 %vm609_vm1, %v1023_v61 }
 0x530   : > { %2794 = vmatpush3.bf16.msra.mxu1 %v2880_v59  ;;  %2824 = vmatpush3.bf16.msra.mxu0 %v2881_v60 }
 0x531   : > { %2795 = vmatprep.mubr.msk.bf16.mxu1 %vm3012_vm0, %v3011_v1  ;;  %2799 = vmatprep.subr.bf16.mxu1 %v3011_v1 }
 0x532   : > { %2825 = vmatprep.mubr.msk.bf16.mxu0 %vm3012_vm0, %v3011_v1  ;;  %2835 = vmatprep.subr.bf16.mxu0 %v3011_v1 }
 0x537   : > { %2796 = vmatmul.mubr.msk.bf16.vlgmr.msra.gmra.mrb[8].mxu1 %vm609_vm1, %v1023_v61  ;;  %2826 = vmatmul.mubr.msk.bf16.vlgmr.msra.gmra.mrb[12].mxu0 %vm609_vm1, %v1023_v61 }
 0x538   : > { %2800 = vmatpush3.bf16.msra.mxu1 %v2882_v62  ;;  %2836 = vmatpush3.bf16.msra.mxu0 %v2883_v63 }
 0x539   : > { %2801 = vmatprep.mubr.msk.bf16.mxu1 %vm3012_vm0, %v3011_v1  ;;  %2805 = vmatprep.subr.bf16.mxu1 %v3011_v1 }
 0x53a   : > { %2837 = vmatprep.mubr.msk.bf16.mxu0 %vm3012_vm0, %v3011_v1 }
 0x53f   : > { %2802 = vmatmul.mubr.msk.bf16.vlgmr.msra.gmra.mrb[12].mxu1 %vm609_vm1, %v1023_v61  ;;  %2838 = vmatmul.mubr.msk.bf16.vlgmr.msra.gmra.mrb[16].mxu0 %vm609_vm1, %v1023_v61 }
 0x540   : > { %2806 = vmatpush3.bf16.msra.mxu1 %v2884_v0  ;;  %2807 = vmatprep.mubr.msk.bf16.mxu1 %vm3012_vm0, %v3011_v1 }
 0x541   : > { %2817 = vmatprep.subr.bf16.mxu1 %v3011_v1  ;;  %1667 = vmatprep.mubr.bf16.mxu0 %v3013_v19 }
 0x547   : > { %2808 = vmatmul.mubr.msk.bf16.vlgmr.msra.gmra.mrb[16].mxu1 %vm609_vm1, %v1023_v61 }
 0x548   : > { %2818 = vmatpush3.bf16.msra.mxu1 %v2885_v2  ;;  %2819 = vmatprep.mubr.msk.bf16.mxu1 %vm3012_vm0, %v3011_v1 }
 0x549   : > { %2829 = vmatprep.subr.bf16.mxu1 %v3011_v1 }
 0x54f   : > { %2820 = vmatmul.mubr.msk.bf16.vlgmr.msra.gmra.mrb[20].mxu1 %vm609_vm1, %v1023_v61 }
 0x550   : > { %2830 = vmatpush3.bf16.msra.mxu1 %v2886_v3  ;;  %2831 = vmatprep.mubr.msk.bf16.mxu1 %vm3012_vm0, %v3011_v1 }
 0x551   : > { %1501 = vmatprep.subr.bf16.mxu1 %v3013_v19 }
 0x557   : > { %2832 = vmatmul.mubr.msk.bf16.vlgmr.msra.gmra.mrb[24].mxu1 %vm609_vm1, %v1023_v61 }
 0x558   : > { %2588 = vmatprep.mubr.msk.bf16.mxu1 %vm609_vm1, %v2587_v5 }
 0x602   : > { %v1069_v1 = vpop.f32.mrb[4].mxu1  ;;  %v1269_v7 = vpop.f32.mrb[8].mxu0 }
 0x603   : > { %v2791_v8 = vpop.f32.mrb[5].mxu1  ;;  %v2815_v9 = vpop.f32.mrb[9].mxu0 }
 0x604   : > { %v1072_v10 = vpop.f32.mrb[6].mxu1  ;;  %v1272_v11 = vpop.f32.mrb[10].mxu0  ;;  %v1575_v8 = vld [vmem:[%s3613_s15] sm:$0xff] }
 0x605   : > { %v1476_v12 = vpack.c.bf16 %v1072_v10, %v1069_v1  ;;  %v1480_v13 = vpack.c.bf16 %v1272_v11, %v1269_v7  ;;  %v2792_v14 = vpop.f32.mrb[7].mxu1  ;;  %v2816_v15 = vpop.f32.mrb[11].mxu0  ;;  %v1568_v7 = vld [vmem:[%s3612_s14] sm:$0xff] }
 0x606   : > { %v2407_v9 = vld [vmem:[%s3616_s18] sm:$0x7]  ;;  %v2891_v10 = vld [vmem:[%s3614_s16 + $0x4] ss:$8 sps:$4 sm:$0xff]   ;;  %v2897_v14 = vld [vmem:[%s3614_s16 + $0x14] ss:$8 sps:$4 sm:$0xff]  }
 0x607   : > { %1502 = vmatpush1.bf16.msra.mxu1 %v1476_v12  ;;  %v2894_v11 = vld [vmem:[%s3614_s16 + $0xc4] ss:$8 sps:$4 sm:$0xff]   ;;  %v2889_v12 = vld [vmem:[%s3614_s16] ss:$8 sps:$4 sm:$0xff]   ;;  %1635 = vmatprep.subr.bf16.mxu0 %v2891_v10  ;;  %v2900_v15 = vld [vmem:[%s3614_s16 + $0xd4] ss:$8 sps:$4 sm:$0xff]  }
 0x608   : > { %1503 = vmatprep.subr.bf16.mxu1 %v3013_v19  ;;  %1636 = vmatpush1.bf16.msra.mxu0 %v2889_v12  ;;  %v2955_v10 = vld [vmem:[%s3614_s16 + $0xb0] ss:$8 sps:$4 sm:$0xff]   ;;  %v2963_v12 = vld [vmem:[%s3614_s16 + $0x104] ss:$8 sps:$4 sm:$0xff]  }
 0x609   : > { %1637 = vmatprep.subr.bf16.mxu0 %v2897_v14  ;;  %v2966_v14 = vld [vmem:[%s3614_s16 + $0x114] ss:$8 sps:$4 sm:$0xff]  }
 0x60a   : > { %v1119_v16 = vpop.f32.mrb[8].mxu1  ;;  %v1369_v17 = vpop.f32.mrb[12].mxu0 }
 0x60b   : > { %v2797_v18 = vpop.f32.mrb[9].mxu1  ;;  %v2827_v20 = vpop.f32.mrb[13].mxu0 }
 0x60c   : > { %v1122_v21 = vpop.f32.mrb[10].mxu1  ;;  %v1372_v22 = vpop.f32.mrb[14].mxu0  ;;  %v2903_v18 = vld [vmem:[%s3614_s16 + $0x24] ss:$8 sps:$4 sm:$0xff]  }
 0x60d   : > { %v1477_v23 = vpack.c.bf16 %v1122_v21, %v1119_v16  ;;  %v1482_v24 = vpack.c.bf16 %v1372_v22, %v1369_v17  ;;  %v2798_v25 = vpop.f32.mrb[11].mxu1  ;;  %v2828_v26 = vpop.f32.mrb[15].mxu0  ;;  %v2895_v16 = vld [vmem:[%s3614_s16 + $0x10] ss:$8 sps:$4 sm:$0xff]   ;;  %v2906_v20 = vld [vmem:[%s3614_s16 + $0xe4] ss:$8 sps:$4 sm:$0xff]  }
 0x60e   : > { %v2898_v17 = vld [vmem:[%s3614_s16 + $0xd0] ss:$8 sps:$4 sm:$0xff]   ;;  %1638 = vmatpush1.bf16.msra.mxu0 %v2895_v16  ;;  %v2901_v21 = vld [vmem:[%s3614_s16 + $0x20] ss:$8 sps:$4 sm:$0xff]   ;;  %v2969_v16 = vld [vmem:[%s3614_s16 + $0x124] ss:$8 sps:$4 sm:$0xff]  }
 0x60f   : > { %1504 = vmatpush1.bf16.msra.mxu1 %v1477_v23  ;;  %v2904_v22 = vld [vmem:[%s3614_s16 + $0xe0] ss:$8 sps:$4 sm:$0xff]   ;;  %1639 = vmatprep.subr.bf16.mxu0 %v2903_v18  ;;  %v2909_v23 = vld [vmem:[%s3614_s16 + $0x34] ss:$8 sps:$4 sm:$0xff]   ;;  %v2907_v25 = vld [vmem:[%s3614_s16 + $0x30] ss:$8 sps:$4 sm:$0xff]  }
 0x610   : > { %1505 = vmatprep.subr.bf16.mxu1 %v3013_v19  ;;  %v2910_v26 = vld [vmem:[%s3614_s16 + $0xf0] ss:$8 sps:$4 sm:$0xff]   ;;  %v2972_v18 = vld [vmem:[%s3614_s16 + $0x134] ss:$8 sps:$4 sm:$0xff]  }
 0x612   : > { %v1169_v27 = vpop.f32.mrb[12].mxu1  ;;  %v1469_v28 = vpop.f32.mrb[16].mxu0  ;;  %1640 = vmatpush1.bf16.msra.mxu0 %v2901_v21  ;;  %v2975_v21 = vld [vmem:[%s3614_s16 + $0x184] ss:$8 sps:$4 sm:$0xff]  }
 0x613   : > { %v2803_v29 = vpop.f32.mrb[13].mxu1  ;;  %v2839_v30 = vpop.f32.mrb[17].mxu0  ;;  %1641 = vmatprep.subr.bf16.mxu0 %v2909_v23  ;;  %v2978_v23 = vld [vmem:[%s3614_s16 + $0x194] ss:$8 sps:$4 sm:$0xff]  }
 0x614   : > { %v1172_v31 = vpop.f32.mrb[14].mxu1  ;;  %v1472_v35 = vpop.f32.mrb[18].mxu0 }
 0x615   : > { %v1478_v37 = vpack.c.bf16 %v1172_v31, %v1169_v27  ;;  %v1484_v38 = vpack.c.bf16 %v1472_v35, %v1469_v28  ;;  %v2804_v39 = vpop.f32.mrb[15].mxu1  ;;  %v2840_v40 = vpop.f32.mrb[19].mxu0  ;;  %v2915_v27 = vld [vmem:[%s3614_s16 + $0x44] ss:$8 sps:$4 sm:$0xff]  }
 0x616   : > { %1642 = vmatpush1.bf16.msra.mxu0 %v2907_v25  ;;  %v2918_v28 = vld [vmem:[%s3614_s16 + $0x144] ss:$8 sps:$4 sm:$0xff]  }
 0x617   : > { %1506 = vmatpush1.bf16.msra.mxu1 %v1478_v37  ;;  %1725 = vmatprep.subr.bf16.mxu0 %v2915_v27  ;;  %v2981_v25 = vld [vmem:[%s3614_s16 + $0x1a4] ss:$8 sps:$4 sm:$0xff]   ;;  %v2984_v27 = vld [vmem:[%s3614_s16 + $0x1b4] ss:$8 sps:$4 sm:$0xff]  }
 0x618   : > { %1507 = vmatprep.subr.bf16.mxu1 %v3013_v19 }
 0x61a   : > { %v1219_v41 = vpop.f32.mrb[16].mxu1 }
 0x61b   : > { %v2809_v42 = vpop.f32.mrb[17].mxu1 }
 0x61c   : > { %v1222_v43 = vpop.f32.mrb[18].mxu1 }
 0x61d   : > { %v1479_v44 = vpack.c.bf16 %v1222_v43, %v1219_v41  ;;  %v2810_v33 = vpop.f32.mrb[19].mxu1 }
 0x61f   : > { %1508 = vmatpush1.bf16.msra.mxu1 %v1479_v44 }
 0x620   : > { %1509 = vmatprep.subr.bf16.mxu1 %v3013_v19 }
 0x622   : > { %v1319_v45 = vpop.f32.mrb[20].mxu1 }
 0x623   : > { %v2821_v46 = vpop.f32.mrb[21].mxu1  ;;  %1510 = vmatpush1.bf16.msra.mxu1 %v1480_v13  ;;  %v2892_v13 = vld [vmem:[%s3614_s16 + $0xc0] ss:$8 sps:$4 sm:$0xff]  }
 0x624   : > { %v1322_v47 = vpop.f32.mrb[22].mxu1  ;;  %1511 = vmatprep.subr.bf16.mxu1 %v3013_v19 }
 0x625   : > { %v1481_v32 = vpack.c.bf16 %v1322_v47, %v1319_v45  ;;  %v2822_v48 = vpop.f32.mrb[23].mxu1 }
 0x626   : > { %v2916_v48 = vld [vmem:[%s3614_s16 + $0x140] ss:$8 sps:$4 sm:$0xff]  }
 0x627   : > { %1512 = vmatpush1.bf16.msra.mxu1 %v1481_v32  ;;  %v2913_v32 = vld [vmem:[%s3614_s16 + $0x40] ss:$8 sps:$4 sm:$0xff]  }
 0x628   : > { %1513 = vmatprep.subr.bf16.mxu1 %v3013_v19 }
 0x62a   : > { %v1419_v49 = vpop.f32.mrb[24].mxu1 }
 0x62b   : > { %v2833_v50 = vpop.f32.mrb[25].mxu1  ;;  %1514 = vmatpush1.bf16.msra.mxu1 %v1482_v24  ;;  %v2912_v24 = vld [vmem:[%s3614_s16 + $0xf4] ss:$8 sps:$4 sm:$0xff]  }
 0x62c   : > { %v1422_v51 = vpop.f32.mrb[26].mxu1  ;;  %1515 = vmatprep.subr.bf16.mxu1 %v3013_v19  ;;  %v2921_v50 = vld [vmem:[%s3614_s16 + $0x54] ss:$8 sps:$4 sm:$0xff]  }
 0x62d   : > { %v1483_v52 = vpack.c.bf16 %v1422_v51, %v1419_v49  ;;  %v2834_v53 = vpop.f32.mrb[27].mxu1  ;;  %v2924_v51 = vld [vmem:[%s3614_s16 + $0x154] ss:$8 sps:$4 sm:$0xff]  }
 0x62e   : > { %v2922_v53 = vld [vmem:[%s3614_s16 + $0x150] ss:$8 sps:$4 sm:$0xff]  }
 0x62f   : > { %1516 = vmatpush1.bf16.msra.mxu1 %v1483_v52  ;;  %v2919_v52 = vld [vmem:[%s3614_s16 + $0x50] ss:$8 sps:$4 sm:$0xff]  }
 0x630   : > { %1517 = vmatprep.subr.bf16.mxu1 %v3013_v19 }
 0x633   : > { %1518 = vmatpush1.bf16.msra.mxu1 %v1484_v38 }
 0x634   : > { %1905 = vmatprep.subr.bf16.mxu1 %v2894_v11  ;;  %v2958_v11 = vld [vmem:[%s3614_s16 + $0x1f0] ss:$8 sps:$4 sm:$0xff]  }
 0x636   : > { %1534 = vmatmul.mubr.bf16.vlgmr.msra.gmra.mrb[28].mxu1 %v2586_v34  ;;  %v2927_v34 = vld [vmem:[%s3614_s16 + $0x64] ss:$8 sps:$4 sm:$0xff]  }
 0x637   : > { %1937 = vmatprep.mubr.bf16.mxu1 %v3013_v19  ;;  %1906 = vmatpush1.bf16.msra.mxu1 %v2892_v13  ;;  %v2961_v13 = vld [vmem:[%s3614_s16 + $0x100] ss:$8 sps:$4 sm:$0xff]  }
 0x638   : > { %1907 = vmatprep.subr.bf16.mxu1 %v2900_v15  ;;  %v2964_v15 = vld [vmem:[%s3614_s16 + $0x110] ss:$8 sps:$4 sm:$0xff]  }
 0x63b   : > { %1908 = vmatpush1.bf16.msra.mxu1 %v2898_v17  ;;  %v2967_v17 = vld [vmem:[%s3614_s16 + $0x120] ss:$8 sps:$4 sm:$0xff]  }
 0x63c   : > { %1909 = vmatprep.subr.bf16.mxu1 %v2906_v20  ;;  %v2970_v20 = vld [vmem:[%s3614_s16 + $0x130] ss:$8 sps:$4 sm:$0xff]  }
 0x63f   : > { %1910 = vmatpush1.bf16.msra.mxu1 %v2904_v22  ;;  %v2973_v22 = vld [vmem:[%s3614_s16 + $0x180] ss:$8 sps:$4 sm:$0xff]  }
 0x640   : > { %1911 = vmatprep.subr.bf16.mxu1 %v2912_v24  ;;  %v2976_v24 = vld [vmem:[%s3614_s16 + $0x190] ss:$8 sps:$4 sm:$0xff]  }
 0x643   : > { %1912 = vmatpush1.bf16.msra.mxu1 %v2910_v26  ;;  %v2979_v26 = vld [vmem:[%s3614_s16 + $0x1a0] ss:$8 sps:$4 sm:$0xff]  }
 0x644   : > { %2085 = vmatprep.subr.bf16.mxu1 %v2918_v28  ;;  %v2982_v28 = vld [vmem:[%s3614_s16 + $0x1b0] ss:$8 sps:$4 sm:$0xff]  }
 0x709   : > { %v1535_v54 = vpop.f32.mrb[28].mxu1 }
 0x70a   : > { %v1536_v55 = vadd.f32 %v1535_v54, %v1490_v36  ;;  %v1537_v56 = vpop.f32.mrb[29].mxu1  ;;  %v2930_v36 = vld [vmem:[%s3614_s16 + $0x164] ss:$8 sps:$4 sm:$0xff]   ;;  %v2925_v54 = vld [vmem:[%s3614_s16 + $0x60] ss:$8 sps:$4 sm:$0xff]  }
 0x70b   : > { %v1538_v57 = vpop.f32.mrb[30].mxu1  ;;  %v2933_v56 = vld [vmem:[%s3614_s16 + $0x74] ss:$8 sps:$4 sm:$0xff]  }
 0x70c   : > { %v1539_v58 = vpop.f32.mrb[31].mxu1  ;;  %v1542_v59 = vsel %vm1541_vm6, %v1536_v55, 0.0  ;;  %v2936_v57 = vld [vmem:[%s3614_s16 + $0x174] ss:$8 sps:$4 sm:$0xff]  }
 0x70d   : > { %1543 = vadd.xlane.f32.xlu1 %v1542_v59  ;;  %v2931_v58 = vld [vmem:[%s3614_s16 + $0x70] ss:$8 sps:$4 sm:$0xff]  }
 0x70e   : > { %v2934_v59 = vld [vmem:[%s3614_s16 + $0x170] ss:$8 sps:$4 sm:$0xff]  }
 0x79a   : > { %v1544_v60 = vpop.xlane.xlu1 %1543 }
 0x79b   : > { %v1545_v61 = vrot.slane %v1544_v60, 4 }
 0x79d   : > { %v1546_v62 = vadd.f32 %v1545_v61, %v1544_v60  ;;  %v2939_v60 = vld [vmem:[%s3614_s16 + $0x84] ss:$8 sps:$4 sm:$0xff]  }
 0x79e   : > { %v2942_v61 = vld [vmem:[%s3614_s16 + $0x1c4] ss:$8 sps:$4 sm:$0xff]  }
 0x79f   : > { %v1547_v63 = vrot.slane %v1546_v62, 2 }
 0x7a1   : > { %v1548_v0 = vadd.f32 %v1547_v63, %v1546_v62  ;;  %v2937_v62 = vld [vmem:[%s3614_s16 + $0x80] ss:$8 sps:$4 sm:$0xff]  }
 0x7a2   : > { %v2940_v63 = vld [vmem:[%s3614_s16 + $0x1c0] ss:$8 sps:$4 sm:$0xff]  }
 0x7a3   : > { %v1549_v2 = vrot.slane %v1548_v0, 1 }
 0x7a5   : > { %v1550_v3 = vadd.f32 %v1549_v2, %v1548_v0  ;;  %v2945_v0 = vld [vmem:[%s3614_s16 + $0x94] ss:$8 sps:$4 sm:$0xff]  }
 0x7a6   : > { %v2948_v2 = vld [vmem:[%s3614_s16 + $0x1d4] ss:$8 sps:$4 sm:$0xff]  }
 0x7a7   : > { %v1552_v4 = vmul.f32 0.001953125, %v1550_v3  ;;  %v2943_v3 = vld [vmem:[%s3614_s16 + $0x90] ss:$8 sps:$4 sm:$0xff]  }
 0x7a9   : > { %v1553_v5 = vsub.f32 %v1536_v55, %v1552_v4  ;;  %v2928_v55 = vld [vmem:[%s3614_s16 + $0x160] ss:$8 sps:$4 sm:$0xff]   ;;  %v2946_v4 = vld [vmem:[%s3614_s16 + $0x1d0] ss:$8 sps:$4 sm:$0xff]  }
 0x7ab   : > { %v1554_v6 = vmul.f32 %v1553_v5, %v1553_v5 }
 0x7ad   : > { %v1555_v1 = vsel %vm1541_vm6, %v1554_v6, 0.0  ;;  %v2954_v6 = vld [vmem:[%s3614_s16 + $0x1e4] ss:$8 sps:$4 sm:$0xff]  }
 0x7ae   : > { %1556 = vadd.xlane.f32.xlu1 %v1555_v1  ;;  %v2949_v1 = vld [vmem:[%s3614_s16 + $0xa0] ss:$8 sps:$4 sm:$0xff]  }
 0x7bf   : > { %1571 = vperm.xlu1 %2854, %v1568_v7   ;;  %v2952_v7 = vld [vmem:[%s3614_s16 + $0x1e0] ss:$8 sps:$4 sm:$0xff]  }
 0x7c3   : > { %1578 = vperm.xlu1 %2854, %v1575_v8   ;;  %v2957_v8 = vld [vmem:[%s3614_s16 + $0xb4] ss:$8 sps:$4 sm:$0xff]  }
 0x7c7   : > { %2410 = vperm.xlu1 %2854, %v2407_v9   ;;  %v2960_v9 = vld [vmem:[%s3614_s16 + $0x1f4] ss:$8 sps:$4 sm:$0xff]  }
 0x83b   : > { %v1557_v29 = vpop.xlane.xlu1 %1556 }
 0x83c   : > { %v1558_v30 = vrot.slane %v1557_v29, 4 }
 0x83e   : > { %v1559_v31 = vadd.f32 %v1558_v30, %v1557_v29  ;;  %v2987_v29 = vld [vmem:[%s3614_s16 + $0x204] ss:$8 sps:$4 sm:$0xff]   ;;  %v2985_v30 = vld [vmem:[%s3614_s16 + $0x200] ss:$8 sps:$4 sm:$0xff]  }
 0x83f   : > { %v1572_v42 = vpop.permute.xlu1 %1571 }
 0x840   : > { %v1560_v35 = vrot.slane %v1559_v31, 2 }
 0x842   : > { %v1561_v37 = vadd.f32 %v1560_v35, %v1559_v31  ;;  %v2990_v31 = vld [vmem:[%s3614_s16 + $0x214] ss:$8 sps:$4 sm:$0xff]   ;;  %v2988_v35 = vld [vmem:[%s3614_s16 + $0x210] ss:$8 sps:$4 sm:$0xff]  }
 0x843   : > { %v1579_v45 = vpop.permute.xlu1 %1578 }
 0x844   : > { %v1562_v38 = vrot.slane %v1561_v37, 1 }
 0x846   : > { %v1563_v39 = vadd.f32 %v1562_v38, %v1561_v37  ;;  %v2993_v37 = vld [vmem:[%s3614_s16 + $0x224] ss:$8 sps:$4 sm:$0xff]   ;;  %v2991_v38 = vld [vmem:[%s3614_s16 + $0x220] ss:$8 sps:$4 sm:$0xff]  }
 0x848   : > { %v1564_v40 = vmul.f32 0.001953125, %v1563_v39  ;;  %v2996_v39 = vld [vmem:[%s3614_s16 + $0x234] ss:$8 sps:$4 sm:$0xff]  }
 0x84a   : > { %v1565_v41 = vadd.f32 1e-05, %v1564_v40 }
 0x84c   : > { %3001 = vrsqrt.f32 %v1565_v41 }
 0x856   : > { %v3002_v43 = vpop.eup %3001 }
 0x857   : > { %v1567_v44 = vmul.f32 %v3002_v43, %v1553_v5  ;;  %v2951_v5 = vld [vmem:[%s3614_s16 + $0xa4] ss:$8 sps:$4 sm:$0xff]  }
 0x859   : > { %v1574_v33 = vmul.f32 %v1572_v42, %v1567_v44 }
 0x85b   : > { %v1581_v46 = vadd.f32 %v1579_v45, %v1574_v33 }
 0x85d   : > { %v1582_v47 = vmax.f32 %v1581_v46, 0.0 }
 0x85f   : > { %v3404_v49 = vpack.c.bf16 %v1582_v47, %v1582_v47 }
 0x861   : > { %2597 = vmatmul.mubr.msk.bf16.vlgmr.msra.gmra.mrb[20].mxu0 %vm1541_vm6, %v3404_v49  ;;  %2648 = vmatmul.mubr.msk.bf16.vlgmr.msra.gmra.mrb[32].mxu1 %vm1541_vm6, %v3404_v49 }
 0x862   : > { %1726 = vmatpush1.bf16.msra.mxu0 %v2913_v32  ;;  %2086 = vmatpush1.bf16.msra.mxu1 %v2916_v48 }
 0x863   : > { %1727 = vmatprep.subr.bf16.mxu0 %v2921_v50  ;;  %2087 = vmatprep.subr.bf16.mxu1 %v2924_v51 }
 0x864   : > { %1757 = vmatprep.mubr.bf16.mxu0 %v3013_v19  ;;  %2117 = vmatprep.mubr.bf16.mxu1 %v3013_v19 }
 0x866   : > { %1728 = vmatpush1.bf16.msra.mxu0 %v2919_v52  ;;  %2088 = vmatpush1.bf16.msra.mxu1 %v2922_v53 }
 0x867   : > { %1729 = vmatprep.subr.bf16.mxu0 %v2927_v34  ;;  %2089 = vmatprep.subr.bf16.mxu1 %v2930_v36 }
 0x86a   : > { %1730 = vmatpush1.bf16.msra.mxu0 %v2925_v54  ;;  %2090 = vmatpush1.bf16.msra.mxu1 %v2928_v55 }
 0x86b   : > { %1731 = vmatprep.subr.bf16.mxu0 %v2933_v56  ;;  %2091 = vmatprep.subr.bf16.mxu1 %v2936_v57 }
 0x86e   : > { %1732 = vmatpush1.bf16.msra.mxu0 %v2931_v58  ;;  %2092 = vmatpush1.bf16.msra.mxu1 %v2934_v59 }
 0x86f   : > { %1815 = vmatprep.subr.bf16.mxu0 %v2939_v60  ;;  %2265 = vmatprep.subr.bf16.mxu1 %v2942_v61 }
 0x871   : > { %2614 = vmatmul.mubr.msk.bf16.vlgmr.msra.gmra.mrb[24].mxu0 %vm1541_vm6, %v3404_v49  ;;  %2682 = vmatmul.mubr.msk.bf16.vlgmr.msra.gmra.mrb[36].mxu1 %vm1541_vm6, %v3404_v49 }
 0x872   : > { %1816 = vmatpush1.bf16.msra.mxu0 %v2937_v62  ;;  %2266 = vmatpush1.bf16.msra.mxu1 %v2940_v63 }
 0x873   : > { %1817 = vmatprep.subr.bf16.mxu0 %v2945_v0  ;;  %2267 = vmatprep.subr.bf16.mxu1 %v2948_v2 }
 0x874   : > { %1847 = vmatprep.mubr.bf16.mxu0 %v3013_v19  ;;  %2297 = vmatprep.mubr.bf16.mxu1 %v3013_v19 }
 0x876   : > { %1818 = vmatpush1.bf16.msra.mxu0 %v2943_v3  ;;  %2268 = vmatpush1.bf16.msra.mxu1 %v2946_v4 }
 0x877   : > { %1819 = vmatprep.subr.bf16.mxu0 %v2951_v5  ;;  %2269 = vmatprep.subr.bf16.mxu1 %v2954_v6 }
 0x87a   : > { %1820 = vmatpush1.bf16.msra.mxu0 %v2949_v1  ;;  %2270 = vmatpush1.bf16.msra.mxu1 %v2952_v7 }
 0x87b   : > { %1821 = vmatprep.subr.bf16.mxu0 %v2957_v8  ;;  %2271 = vmatprep.subr.bf16.mxu1 %v2960_v9 }
 0x87e   : > { %1822 = vmatpush1.bf16.msra.mxu0 %v2955_v10  ;;  %2272 = vmatpush1.bf16.msra.mxu1 %v2958_v11 }
 0x87f   : > { %1995 = vmatprep.subr.bf16.mxu0 %v2963_v12 }
 0x881   : > { %2631 = vmatmul.mubr.msk.bf16.vlgmr.msra.gmra.mrb[28].mxu0 %vm1541_vm6, %v3404_v49  ;;  %2716 = vmatmul.mubr.msk.bf16.vlgmr.msra.gmra.mrb[40].mxu1 %vm1541_vm6, %v3404_v49 }
 0x882   : > { %1996 = vmatpush1.bf16.msra.mxu0 %v2961_v13  ;;  %2027 = vmatprep.mubr.bf16.mxu0 %v3013_v19 }
 0x883   : > { %1997 = vmatprep.subr.bf16.mxu0 %v2966_v14  ;;  %2456 = vmatprep.mubr.bf16.mxu1 %v3013_v19 }
 0x886   : > { %1998 = vmatpush1.bf16.msra.mxu0 %v2964_v15 }
 0x887   : > { %1999 = vmatprep.subr.bf16.mxu0 %v2969_v16 }
 0x88a   : > { %2000 = vmatpush1.bf16.msra.mxu0 %v2967_v17 }
 0x88b   : > { %2001 = vmatprep.subr.bf16.mxu0 %v2972_v18 }
 0x88e   : > { %2002 = vmatpush1.bf16.msra.mxu0 %v2970_v20  ;;  %v2406_v20 = vld [vmem:[%s3615_s17] sm:$0x3] }
 0x88f   : > { %2175 = vmatprep.subr.bf16.mxu0 %v2975_v21  ;;  %v2411_v21 = vpop.permute.xlu1 %2410 }
 0x891   : > { %2665 = vmatmul.mubr.msk.bf16.vlgmr.msra.gmra.mrb[32].mxu0 %vm1541_vm6, %v3404_v49 }
 0x892   : > { %2176 = vmatpush1.bf16.msra.mxu0 %v2973_v22  ;;  %2207 = vmatprep.mubr.bf16.mxu0 %v3013_v19 }
 0x893   : > { %2177 = vmatprep.subr.bf16.mxu0 %v2978_v23 }
 0x896   : > { %2178 = vmatpush1.bf16.msra.mxu0 %v2976_v24 }
 0x897   : > { %2179 = vmatprep.subr.bf16.mxu0 %v2981_v25 }
 0x89a   : > { %2180 = vmatpush1.bf16.msra.mxu0 %v2979_v26 }
 0x89b   : > { %2181 = vmatprep.subr.bf16.mxu0 %v2984_v27 }
 0x89e   : > { %2182 = vmatpush1.bf16.msra.mxu0 %v2982_v28 }
 0x89f   : > { %2355 = vmatprep.subr.bf16.mxu0 %v2987_v29 }
 0x8a1   : > { %2699 = vmatmul.mubr.msk.bf16.vlgmr.msra.gmra.mrb[36].mxu0 %vm1541_vm6, %v3404_v49 }
 0x8a2   : > { %2356 = vmatpush1.bf16.msra.mxu0 %v2985_v30  ;;  %2387 = vmatprep.mubr.bf16.mxu0 %v3013_v19  ;;  %v2994_v19 = vld [vmem:[%s3614_s16 + $0x230] ss:$8 sps:$4 sm:$0xff]  }
 0x8a3   : > { %2357 = vmatprep.subr.bf16.mxu0 %v2990_v31 }
 0x8a6   : > { %2358 = vmatpush1.bf16.msra.mxu0 %v2988_v35 }
 0x8a7   : > { %2359 = vmatprep.subr.bf16.mxu0 %v2993_v37 }
 0x8aa   : > { %2360 = vmatpush1.bf16.msra.mxu0 %v2991_v38 }
 0x8ab   : > { %2361 = vmatprep.subr.bf16.mxu0 %v2996_v39 }
 0x8ae   : > { %2362 = vmatpush1.bf16.msra.mxu0 %v2994_v19 }
 0x8b1   : > { %2733 = vmatmul.mubr.msk.bf16.vlgmr.msra.gmra.mrb[40].mxu0 %vm1541_vm6, %v3404_v49 }
 0x934   : > { %v1669_v40 = vpop.f32.mrb[20].mxu0  ;;  %v1939_v41 = vpop.f32.mrb[32].mxu1 }
 0x935   : > { %v1671_v42 = vpop.f32.mrb[21].mxu0  ;;  %v1941_v43 = vpop.f32.mrb[33].mxu1 }
 0x936   : > { %v1673_v44 = vpop.f32.mrb[22].mxu0  ;;  %v1943_v33 = vpop.f32.mrb[34].mxu1 }
 0x937   : > { %v1674_v45 = vpop.f32.mrb[23].mxu0  ;;  %v1944_v46 = vpop.f32.mrb[35].mxu1 }
 0x944   : > { %v1759_v47 = vpop.f32.mrb[24].mxu0  ;;  %v2119_v32 = vpop.f32.mrb[36].mxu1 }
 0x945   : > { %v2396_v48 = vpack.c.bf16 %v1759_v47, %v1669_v40  ;;  %v1761_v50 = vpop.f32.mrb[25].mxu0  ;;  %v2121_v51 = vpop.f32.mrb[37].mxu1 }
 0x946   : > { %v2397_v52 = vpack.c.bf16 %v1761_v50, %v1671_v42  ;;  %v1763_v53 = vpop.f32.mrb[26].mxu0  ;;  %v2123_v34 = vpop.f32.mrb[38].mxu1 }
 0x947   : > { %v1764_v36 = vpop.f32.mrb[27].mxu0  ;;  %v2124_v54 = vpop.f32.mrb[39].mxu1 }
 0x948   : > { %2424 = vmatprep.subr.bf16.mxu1 %v2397_v52 }
 0x949   : > { %2425 = vmatpush1.bf16.msra.mxu1 %v2396_v48 }
 0x954   : > { %v1849_v49 = vpop.f32.mrb[28].mxu0  ;;  %v2299_v55 = vpop.f32.mrb[40].mxu1 }
 0x955   : > { %v2398_v56 = vpack.c.bf16 %v1939_v41, %v1849_v49  ;;  %v1851_v57 = vpop.f32.mrb[29].mxu0  ;;  %v2301_v58 = vpop.f32.mrb[41].mxu1 }
 0x956   : > { %v2399_v59 = vpack.c.bf16 %v1941_v43, %v1851_v57  ;;  %v1853_v60 = vpop.f32.mrb[30].mxu0  ;;  %v2303_v61 = vpop.f32.mrb[42].mxu1 }
 0x957   : > { %v1854_v62 = vpop.f32.mrb[31].mxu0  ;;  %v2304_v63 = vpop.f32.mrb[43].mxu1 }
 0x958   : > { %2426 = vmatprep.subr.bf16.mxu1 %v2399_v59 }
 0x959   : > { %2427 = vmatpush1.bf16.msra.mxu1 %v2398_v56 }
 0x964   : > { %v2029_v0 = vpop.f32.mrb[32].mxu0 }
 0x965   : > { %v2400_v2 = vpack.c.bf16 %v2119_v32, %v2029_v0  ;;  %v2031_v3 = vpop.f32.mrb[33].mxu0 }
 0x966   : > { %v2401_v4 = vpack.c.bf16 %v2121_v51, %v2031_v3  ;;  %v2033_v5 = vpop.f32.mrb[34].mxu0 }
 0x967   : > { %v2034_v6 = vpop.f32.mrb[35].mxu0 }
 0x968   : > { %2428 = vmatprep.subr.bf16.mxu1 %v2401_v4 }
 0x969   : > { %2429 = vmatpush1.bf16.msra.mxu1 %v2400_v2 }
 0x974   : > { %v2209_v1 = vpop.f32.mrb[36].mxu0 }
 0x975   : > { %v2402_v7 = vpack.c.bf16 %v2299_v55, %v2209_v1  ;;  %v2211_v8 = vpop.f32.mrb[37].mxu0 }
 0x976   : > { %v2403_v9 = vpack.c.bf16 %v2301_v58, %v2211_v8  ;;  %v2213_v10 = vpop.f32.mrb[38].mxu0 }
 0x977   : > { %v2214_v11 = vpop.f32.mrb[39].mxu0 }
 0x978   : > { %2430 = vmatprep.subr.bf16.mxu1 %v2403_v9 }
 0x979   : > { %2431 = vmatpush1.bf16.msra.mxu1 %v2402_v7 }
 0x984   : > { %v2389_v12 = vpop.f32.mrb[40].mxu0 }
 0x985   : > { %v2404_v13 = vpack.c.bf16 %v2389_v12, %v2389_v12  ;;  %v2391_v14 = vpop.f32.mrb[41].mxu0 }
 0x986   : > { %v2405_v15 = vpack.c.bf16 %v2391_v14, %v2391_v14  ;;  %v2393_v16 = vpop.f32.mrb[42].mxu0 }
 0x987   : > { %v2419_v17 = vsel %vm2417_vm7, %v2404_v13, 0  ;;  %v2394_v18 = vpop.f32.mrb[43].mxu0 }
 0x988   : > { %2734 = vmatprep.subr.msk.bf16.mxu1 %vm2417_vm7, %v2405_v15 }
 0x989   : > { %2433 = vmatpush1.bf16.msra.mxu1 %v2419_v17 }
 0x98c   : > { %2735 = vmatmul.mubr.msk.bf16.vlgmr.msra.gmra.mrb[44].mxu1 %vm2413_vm8, %v2406_v20 }
 0xa5f   : > { %v2458_v22 = vpop.f32.mrb[44].mxu1 }
 0xa60   : > { %v2459_v23 = vadd.f32 %v2458_v22, %v2411_v21  ;;  %v2460_v24 = vpop.f32.mrb[45].mxu1 }
 0xa61   : > { %v2461_v25 = vadd.f32 %v2460_v24, %v2411_v21  ;;  %v2462_v26 = vpop.f32.mrb[46].mxu1 }
 0xa62   : > { %v2463_v27 = vpop.f32.mrb[47].mxu1 }
 0xa63   : > { %v2467_v28 = vcombine.low %v2459_v23, %v2461_v25 }
 0xa65   : > { %2469 = vst [vmem:[%s596_s3] sm:$0x77] %v2467_v28 }
 0xa66 PF: > { %s29_s0 = sadd.s32 1, %s3009_s0  }
 0xa67   : > { %p26_p4 = scmp.ge.s32.totalorder %s29_s0, 4  }
 0xa69   :  { %28 = sbr.rel (!%p26_p4) target bundleno = 5 (0x5), region = 142 }

</bundles_post_ra>
